<compile_context>
chip_gen: v6e
topology: v6e:2x2x1
jax: 0.10.0
libtpu: 0.0.40
codegen_flags: <defaults>
</compile_context>

<pallas_src>
import numpy as np

import jax
import jax.numpy as jnp
from jax import lax
from jax.experimental import pallas as pl
from jax.experimental.pallas import tpu as pltpu


# ---------------------------------------------------------------------------
# Structural (constant) matrices -- pure numpy, folded into the jaxpr as consts.
# ---------------------------------------------------------------------------
def _block_diag(mat, B):
    """Block-diagonal replication of `mat` over the batch dimension."""
    return np.kron(np.eye(B, dtype=np.float32), mat.astype(np.float32))


def _row_shift_mats(B, H, K=3, pad=1):
    """S_k (K, B*H, B*H): (S_k @ A)[b*H+y] = A[b*H + y + k - pad]  (0 outside image)."""
    return np.stack([_block_diag(np.eye(H, H, k=k - pad, dtype=np.float32), B)
                     for k in range(K)])


def _pool_row_mats(B, H):
    """P_d (2, B*H/2, B*H): (P_d @ A)[b*Ho+y] = A[b*H + 2*y + d]."""
    Ho = H // 2
    mats = []
    for d in (0, 1):
        m = np.zeros((Ho, H), np.float32)
        m[np.arange(Ho), 2 * np.arange(Ho) + d] = 1.0
        mats.append(_block_diag(m, B))
    return np.stack(mats)


def _pool_col_mats(W, C):
    """R_d (2, W*C, W/2*C): (A @ R_d)[:, xo*C+c] = A[:, (2*xo+d)*C + c]."""
    Wo = W // 2
    mats = []
    for d in (0, 1):
        m = np.zeros((W, Wo), np.float32)
        m[2 * np.arange(Wo) + d, np.arange(Wo)] = 1.0
        mats.append(np.kron(m, np.eye(C, dtype=np.float32)))
    return np.stack(mats)


def _tconv_row_mats(B, H):
    """U_k (2, B*2H, B*H): (U_k @ T)[b*2H + 2*y + k] = T[b*H + y], other rows 0."""
    mats = []
    for k in (0, 1):
        m = np.zeros((2 * H, H), np.float32)
        m[2 * np.arange(H) + k, np.arange(H)] = 1.0
        mats.append(_block_diag(m, B))
    return np.stack(mats)


# ---------------------------------------------------------------------------
# Weight-dependent lane-mixing matrices (tiny XLA preprocessing in the wrapper).
# ---------------------------------------------------------------------------
def _conv_lane_mats(w_pt, W):
    """3x3 conv (padding=1) folded over the lane (x,cin)->(x,cout) axis.

    w_pt: (Cout, Cin, 3, 3) PyTorch layout.  Returns (3, W*Cin, W*Cout); the
    k-th matrix handles kernel row ky=k, mixing the kx taps and the channels.
    """
    Cout, Cin, KH, KW = w_pt.shape
    mats = []
    for ky in range(KH):
        m = jnp.zeros((W * Cin, W * Cout), jnp.float32)
        for kx in range(KW):
            # band[xi, xo] = 1 iff xi == xo + kx - 1  (edge clipping == zero padding)
            band = np.eye(W, W, k=1 - kx, dtype=np.float32)
            wt = jnp.transpose(w_pt[:, :, ky, kx])                 # (Cin, Cout)
            m = m + jnp.einsum("ab,cd->acbd", band, wt).reshape(W * Cin, W * Cout)
        mats.append(m)
    return jnp.stack(mats)


def _tconv_lane_mats(w_pt, W):
    """2x2 / stride-2 transposed conv folded over the lane axis.

    w_pt: (Cin, Cout, 2, 2) PyTorch layout.  Returns (2, W*Cin, 2W*Cout); the
    k-th matrix handles kernel row ky=k and scatters column x -> 2x+kx.
    """
    Cin, Cout, KH, KW = w_pt.shape
    mats = []
    for ky in range(KH):
        m = jnp.zeros((W * Cin, 2 * W * Cout), jnp.float32)
        for kx in range(KW):
            scat = np.zeros((W, 2 * W), np.float32)
            scat[np.arange(W), 2 * np.arange(W) + kx] = 1.0
            m = m + jnp.einsum("ab,cd->acbd", scat, w_pt[:, :, ky, kx]).reshape(
                W * Cin, 2 * W * Cout)
        mats.append(m)
    return jnp.stack(mats)


# ---------------------------------------------------------------------------
# The fused Pallas kernel: whole forward pass, everything resident in VMEM.
# ---------------------------------------------------------------------------
def _fused_forward_kernel(a0_ref,
                          s1_ref, m1_ref, b1_ref, p1h_ref, p1w_ref,
                          s2_ref, m2_ref, b2_ref, p2h_ref, p2w_ref,
                          u1_ref, n1_ref, bt1_ref,
                          u2_ref, n2_ref, bt2_ref,
                          out_ref):
    def dot(a, b):
        return jnp.dot(a, b, preferred_element_type=jnp.float32)

    def conv3x3(a, s_ref, m_ref, b_ref):
        # sum over the 3 kernel rows: row shift (S_k) then kx/channel mixing (M_k)
        acc = dot(dot(s_ref[0], a), m_ref[0])
        for k in (1, 2):
            acc = acc + dot(dot(s_ref[k], a), m_ref[k])
        return jnp.maximum(acc + b_ref[...], 0.0)

    def pool2x2(a, ph_ref, pw_ref):
        rows = jnp.maximum(dot(ph_ref[0], a), dot(ph_ref[1], a))     # max over dy
        return jnp.maximum(dot(rows, pw_ref[0]), dot(rows, pw_ref[1]))  # max over dx

    def tconv2x2(a, u_ref, n_ref, b_ref):
        acc = dot(u_ref[0], dot(a, n_ref[0])) + dot(u_ref[1], dot(a, n_ref[1]))
        return acc + b_ref[...]

    x = a0_ref[...]                                          # (B*16, 16)
    x = conv3x3(x, s1_ref, m1_ref, b1_ref)                   # (B*16, 16*16)  conv1+relu
    x = pool2x2(x, p1h_ref, p1w_ref)                         # (B*8,  8*16)   pool
    x = conv3x3(x, s2_ref, m2_ref, b2_ref)                   # (B*8,  8*4)    conv2+relu
    x = pool2x2(x, p2h_ref, p2w_ref)                         # (B*4,  4*4)    pool
    x = jnp.maximum(tconv2x2(x, u1_ref, n1_ref, bt1_ref), 0.0)  # (B*8, 8*16)  t_conv1+relu
    y = tconv2x2(x, u2_ref, n2_ref, bt2_ref)                 # (B*16, 16*1)   t_conv2

    # numerically stable sigmoid (exp on the EUP; exact divide kept so the
    # tight correctness check passes -- pl.reciprocal(..., approx=True) is a
    # free further tweak on v6e/v7x if ~1e-3 error is acceptable)
    e = jnp.exp(-jnp.abs(y))
    r = 1.0 / (1.0 + e)
    out_ref[...] = jnp.where(y >= 0.0, r, e * r)


# ---------------------------------------------------------------------------
# Wrapper: NCHW in / NCHW out, one pallas_call.
# ---------------------------------------------------------------------------
def model_forward(x_nchw, params):
    B, Cin, H, W = x_nchw.shape
    assert Cin == 1 and H % 4 == 0 and W % 4 == 0
    H2, W2, H3, W3 = H // 2, W // 2, H // 4, W // 4
    C1 = params["conv1.weight"].shape[0]      # 16
    C2 = params["conv2.weight"].shape[0]      # 4
    f32 = jnp.float32

    # activations are stored as (B*H, W*C): rows = (batch, y), lanes = (x, channel)
    a0 = x_nchw.astype(f32).reshape(B * H, W)

    # ---- weight / structure preprocessing (tiny; hoistable per MCMC proposal) ----
    s1 = _row_shift_mats(B, H)
    m1 = _conv_lane_mats(params["conv1.weight"].astype(f32), W)
    b1 = jnp.tile(params["conv1.bias"].astype(f32), W)[None, :]
    p1h = _pool_row_mats(B, H)
    p1w = _pool_col_mats(W, C1)
    s2 = _row_shift_mats(B, H2)
    m2 = _conv_lane_mats(params["conv2.weight"].astype(f32), W2)
    b2 = jnp.tile(params["conv2.bias"].astype(f32), W2)[None, :]
    p2h = _pool_row_mats(B, H2)
    p2w = _pool_col_mats(W2, C2)
    u1 = _tconv_row_mats(B, H3)
    n1 = _tconv_lane_mats(params["t_conv1.weight"].astype(f32), W3)
    bt1 = jnp.tile(params["t_conv1.bias"].astype(f32), 2 * W3)[None, :]
    u2 = _tconv_row_mats(B, H2)
    n2 = _tconv_lane_mats(params["t_conv2.weight"].astype(f32), W2)
    bt2 = jnp.tile(params["t_conv2.bias"].astype(f32), 2 * W2)[None, :]

    operands = (a0, s1, m1, b1, p1h, p1w, s2, m2, b2, p2h, p2w,
                u1, n1, bt1, u2, n2, bt2)

    # Single kernel launch; full-array VMEM blocks, no grid / pipelining needed.
    # TODO(synk): for large MCMC batches on v7x, add a grid over the batch with
    # dimension_semantics=("parallel",) so both TensorCores are used (at B=2 the
    # single-core launch is the right choice).
    out = pl.pallas_call(
        _fused_forward_kernel,
        out_shape=jax.ShapeDtypeStruct((B * H, W), f32),
        in_specs=[pl.BlockSpec(memory_space=pltpu.MemorySpace.VMEM)] * len(operands),
        out_specs=pl.BlockSpec(memory_space=pltpu.MemorySpace.VMEM),
    )(*operands)

    return out.reshape(B, 1, H, W)


# ---------------------------------------------------------------------------
# Pure-JAX (XLA) reference for validation
# ---------------------------------------------------------------------------
def reference_forward(x_nchw, params):
    dn = ("NHWC", "HWIO", "NHWC")
    x = jnp.transpose(x_nchw, (0, 2, 3, 1))

    def conv(x, w_pt, b, act):
        w = jnp.transpose(w_pt, (2, 3, 1, 0))
        y = lax.conv_general_dilated(x, w, (1, 1), "SAME", dimension_numbers=dn) + b
        return jnp.maximum(y, 0.0) if act == "relu" else jax.nn.sigmoid(y)

    def pool(x):
        return lax.reduce_window(x, -jnp.inf, lax.max, (1, 2, 2, 1), (1, 2, 2, 1), "VALID")

    def tconv(x, w_pt, b, act):
        # transposed conv == lhs-dilated conv with spatially flipped kernel
        w = jnp.transpose(w_pt[:, :, ::-1, ::-1], (2, 3, 0, 1))     # (kh, kw, Cin, Cout)
        y = lax.conv_general_dilated(x, w, (1, 1), [(1, 1), (1, 1)],
                                     lhs_dilation=(2, 2), dimension_numbers=dn) + b
        return jnp.maximum(y, 0.0) if act == "relu" else jax.nn.sigmoid(y)

    x = conv(x, params["conv1.weight"], params["conv1.bias"], "relu")
    x = pool(x)
    x = conv(x, params["conv2.weight"], params["conv2.bias"], "relu")
    x = pool(x)
    x = tconv(x, params["t_conv1.weight"], params["t_conv1.bias"], "relu")
    x = tconv(x, params["t_conv2.weight"], params["t_conv2.bias"], "sigmoid")
    return jnp.transpose(x, (0, 3, 1, 2))


# ---------------------------------------------------------------------------
if __name__ == "__main__":
    # TODO(synk): only forward() is kernelized; the MCMC helpers (Adam step, MSE
    # loss loops, state_dict noise / (de)serialization) are host-side control
    # logic in the original module, not kernel hot paths.
    key = jax.random.PRNGKey(0)
    ks = jax.random.split(key, 9)
    params = {
        "conv1.weight": jax.random.normal(ks[0], (16, 1, 3, 3), jnp.float32) * 0.2,
        "conv1.bias":   jax.random.normal(ks[1], (16,), jnp.float32) * 0.1,
        "conv2.weight": jax.random.normal(ks[2], (4, 16, 3, 3), jnp.float32) * 0.1,
        "conv2.bias":   jax.random.normal(ks[3], (4,), jnp.float32) * 0.1,
        "t_conv1.weight": jax.random.normal(ks[4], (4, 16, 2, 2), jnp.float32) * 0.2,
        "t_conv1.bias":   jax.random.normal(ks[5], (16,), jnp.float32) * 0.1,
        "t_conv2.weight": jax.random.normal(ks[6], (16, 1, 2, 2), jnp.float32) * 0.2,
        "t_conv2.bias":   jax.random.normal(ks[7], (1,), jnp.float32) * 0.1,
    }
    x = jax.random.uniform(ks[8], (2, 1, 16, 16), jnp.float32)   # NCHW, 1 input channel

    out = jax.block_until_ready(jax.jit(model_forward)(x, params))
    ref = jax.block_until_ready(reference_forward(x, params))

    assert out.shape == (2, 1, 16, 16), out.shape
    err = float(jnp.max(jnp.abs(out - ref)))
    assert jnp.allclose(out, ref, atol=5e-4, rtol=5e-4), err
    print("KERNEL_OK")
</pallas_src>

<mosaic_0001>
module attributes {stable_mosaic.version = 11 : i64} {
  func.func @_fused_forward_kernel(%arg0: memref<32x16xf32, #tpu.memory_space<vmem>>, %arg1: memref<3x32x32xf32, #tpu.memory_space<vmem>>, %arg2: memref<3x16x256xf32, #tpu.memory_space<vmem>>, %arg3: memref<1x256xf32, #tpu.memory_space<vmem>>, %arg4: memref<2x16x32xf32, #tpu.memory_space<vmem>>, %arg5: memref<2x256x128xf32, #tpu.memory_space<vmem>>, %arg6: memref<3x16x16xf32, #tpu.memory_space<vmem>>, %arg7: memref<3x128x32xf32, #tpu.memory_space<vmem>>, %arg8: memref<1x32xf32, #tpu.memory_space<vmem>>, %arg9: memref<2x8x16xf32, #tpu.memory_space<vmem>>, %arg10: memref<2x32x16xf32, #tpu.memory_space<vmem>>, %arg11: memref<2x16x8xf32, #tpu.memory_space<vmem>>, %arg12: memref<2x16x128xf32, #tpu.memory_space<vmem>>, %arg13: memref<1x128xf32, #tpu.memory_space<vmem>>, %arg14: memref<2x32x16xf32, #tpu.memory_space<vmem>>, %arg15: memref<2x128x16xf32, #tpu.memory_space<vmem>>, %arg16: memref<1x16xf32, #tpu.memory_space<vmem>>, %arg17: memref<32x16xf32, #tpu.memory_space<vmem>>) attributes {dimension_semantics = [], scalar_prefetch = 0 : i64, scratch_operands = 0 : i64, tpu.core_type = #tpu.core_type<tc>} {
    %c0 = arith.constant 0 : index
    %c0_0 = arith.constant 0 : index
    %0 = vector.load %arg0[%c0, %c0_0] : memref<32x16xf32, #tpu.memory_space<vmem>>, vector<32x16xf32>
    %c0_1 = arith.constant 0 : index
    %c0_2 = arith.constant 0 : index
    %c0_3 = arith.constant 0 : index
    %1 = vector.load %arg1[%c0_1, %c0_2, %c0_3] : memref<3x32x32xf32, #tpu.memory_space<vmem>>, vector<1x32x32xf32>
    %2 = vector.shape_cast %1 : vector<1x32x32xf32> to vector<32x32xf32>
    %cst = arith.constant dense<0.000000e+00> : vector<32x16xf32>
    %3 = tpu.matmul %2, %0, %cst {dimension_numbers = #tpu.dot_dimension_numbers<[1], [0], [0], [1], [0, 0, 1, 1], [], []>} : vector<32x32xf32>, vector<32x16xf32>, vector<32x16xf32> -> vector<32x16xf32>
    %c0_4 = arith.constant 0 : index
    %c0_5 = arith.constant 0 : index
    %c0_6 = arith.constant 0 : index
    %4 = vector.load %arg2[%c0_4, %c0_5, %c0_6] : memref<3x16x256xf32, #tpu.memory_space<vmem>>, vector<1x16x256xf32>
    %5 = vector.shape_cast %4 : vector<1x16x256xf32> to vector<16x256xf32>
    %cst_7 = arith.constant dense<0.000000e+00> : vector<32x256xf32>
    %6 = tpu.matmul %3, %5, %cst_7 {dimension_numbers = #tpu.dot_dimension_numbers<[1], [0], [0], [1], [0, 0, 1, 1], [], []>} : vector<32x16xf32>, vector<16x256xf32>, vector<32x256xf32> -> vector<32x256xf32>
    %c1 = arith.constant 1 : index
    %c0_8 = arith.constant 0 : index
    %c0_9 = arith.constant 0 : index
    %7 = vector.load %arg1[%c1, %c0_8, %c0_9] : memref<3x32x32xf32, #tpu.memory_space<vmem>>, vector<1x32x32xf32>
    %8 = vector.shape_cast %7 : vector<1x32x32xf32> to vector<32x32xf32>
    %cst_10 = arith.constant dense<0.000000e+00> : vector<32x16xf32>
    %9 = tpu.matmul %8, %0, %cst_10 {dimension_numbers = #tpu.dot_dimension_numbers<[1], [0], [0], [1], [0, 0, 1, 1], [], []>} : vector<32x32xf32>, vector<32x16xf32>, vector<32x16xf32> -> vector<32x16xf32>
    %c1_11 = arith.constant 1 : index
    %c0_12 = arith.constant 0 : index
    %c0_13 = arith.constant 0 : index
    %10 = vector.load %arg2[%c1_11, %c0_12, %c0_13] : memref<3x16x256xf32, #tpu.memory_space<vmem>>, vector<1x16x256xf32>
    %11 = vector.shape_cast %10 : vector<1x16x256xf32> to vector<16x256xf32>
    %cst_14 = arith.constant dense<0.000000e+00> : vector<32x256xf32>
    %12 = tpu.matmul %9, %11, %cst_14 {dimension_numbers = #tpu.dot_dimension_numbers<[1], [0], [0], [1], [0, 0, 1, 1], [], []>} : vector<32x16xf32>, vector<16x256xf32>, vector<32x256xf32> -> vector<32x256xf32>
    %13 = arith.addf %6, %12 : vector<32x256xf32>
    %c2 = arith.constant 2 : index
    %c0_15 = arith.constant 0 : index
    %c0_16 = arith.constant 0 : index
    %14 = vector.load %arg1[%c2, %c0_15, %c0_16] : memref<3x32x32xf32, #tpu.memory_space<vmem>>, vector<1x32x32xf32>
    %15 = vector.shape_cast %14 : vector<1x32x32xf32> to vector<32x32xf32>
    %cst_17 = arith.constant dense<0.000000e+00> : vector<32x16xf32>
    %16 = tpu.matmul %15, %0, %cst_17 {dimension_numbers = #tpu.dot_dimension_numbers<[1], [0], [0], [1], [0, 0, 1, 1], [], []>} : vector<32x32xf32>, vector<32x16xf32>, vector<32x16xf32> -> vector<32x16xf32>
    %c2_18 = arith.constant 2 : index
    %c0_19 = arith.constant 0 : index
    %c0_20 = arith.constant 0 : index
    %17 = vector.load %arg2[%c2_18, %c0_19, %c0_20] : memref<3x16x256xf32, #tpu.memory_space<vmem>>, vector<1x16x256xf32>
    %18 = vector.shape_cast %17 : vector<1x16x256xf32> to vector<16x256xf32>
    %cst_21 = arith.constant dense<0.000000e+00> : vector<32x256xf32>
    %19 = tpu.matmul %16, %18, %cst_21 {dimension_numbers = #tpu.dot_dimension_numbers<[1], [0], [0], [1], [0, 0, 1, 1], [], []>} : vector<32x16xf32>, vector<16x256xf32>, vector<32x256xf32> -> vector<32x256xf32>
    %20 = arith.addf %13, %19 : vector<32x256xf32>
    %c0_22 = arith.constant 0 : index
    %c0_23 = arith.constant 0 : index
    %21 = vector.load %arg3[%c0_22, %c0_23] : memref<1x256xf32, #tpu.memory_space<vmem>>, vector<1x256xf32>
    %22 = vector.broadcast %21 : vector<1x256xf32> to vector<32x256xf32>
    %23 = arith.addf %20, %22 : vector<32x256xf32>
    %cst_24 = arith.constant 0.000000e+00 : f32
    %24 = vector.broadcast %cst_24 : f32 to vector<32x256xf32>
    %25 = arith.maximumf %23, %24 : vector<32x256xf32>
    %c0_25 = arith.constant 0 : index
    %c0_26 = arith.constant 0 : index
    %c0_27 = arith.constant 0 : index
    %26 = vector.load %arg4[%c0_25, %c0_26, %c0_27] : memref<2x16x32xf32, #tpu.memory_space<vmem>>, vector<1x16x32xf32>
    %27 = vector.shape_cast %26 : vector<1x16x32xf32> to vector<16x32xf32>
    %cst_28 = arith.constant dense<0.000000e+00> : vector<16x256xf32>
    %28 = tpu.matmul %27, %25, %cst_28 {dimension_numbers = #tpu.dot_dimension_numbers<[1], [0], [0], [1], [0, 0, 1, 1], [], []>} : vector<16x32xf32>, vector<32x256xf32>, vector<16x256xf32> -> vector<16x256xf32>
    %c1_29 = arith.constant 1 : index
    %c0_30 = arith.constant 0 : index
    %c0_31 = arith.constant 0 : index
    %29 = vector.load %arg4[%c1_29, %c0_30, %c0_31] : memref<2x16x32xf32, #tpu.memory_space<vmem>>, vector<1x16x32xf32>
    %30 = vector.shape_cast %29 : vector<1x16x32xf32> to vector<16x32xf32>
    %cst_32 = arith.constant dense<0.000000e+00> : vector<16x256xf32>
    %31 = tpu.matmul %30, %25, %cst_32 {dimension_numbers = #tpu.dot_dimension_numbers<[1], [0], [0], [1], [0, 0, 1, 1], [], []>} : vector<16x32xf32>, vector<32x256xf32>, vector<16x256xf32> -> vector<16x256xf32>
    %32 = arith.maximumf %28, %31 : vector<16x256xf32>
    %c0_33 = arith.constant 0 : index
    %c0_34 = arith.constant 0 : index
    %c0_35 = arith.constant 0 : index
    %33 = vector.load %arg5[%c0_33, %c0_34, %c0_35] : memref<2x256x128xf32, #tpu.memory_space<vmem>>, vector<1x256x128xf32>
    %34 = vector.shape_cast %33 : vector<1x256x128xf32> to vector<256x128xf32>
    %cst_36 = arith.constant dense<0.000000e+00> : vector<16x128xf32>
    %35 = tpu.matmul %32, %34, %cst_36 {dimension_numbers = #tpu.dot_dimension_numbers<[1], [0], [0], [1], [0, 0, 1, 1], [], []>} : vector<16x256xf32>, vector<256x128xf32>, vector<16x128xf32> -> vector<16x128xf32>
    %c1_37 = arith.constant 1 : index
    %c0_38 = arith.constant 0 : index
    %c0_39 = arith.constant 0 : index
    %36 = vector.load %arg5[%c1_37, %c0_38, %c0_39] : memref<2x256x128xf32, #tpu.memory_space<vmem>>, vector<1x256x128xf32>
    %37 = vector.shape_cast %36 : vector<1x256x128xf32> to vector<256x128xf32>
    %cst_40 = arith.constant dense<0.000000e+00> : vector<16x128xf32>
    %38 = tpu.matmul %32, %37, %cst_40 {dimension_numbers = #tpu.dot_dimension_numbers<[1], [0], [0], [1], [0, 0, 1, 1], [], []>} : vector<16x256xf32>, vector<256x128xf32>, vector<16x128xf32> -> vector<16x128xf32>
    %39 = arith.maximumf %35, %38 : vector<16x128xf32>
    %c0_41 = arith.constant 0 : index
    %c0_42 = arith.constant 0 : index
    %c0_43 = arith.constant 0 : index
    %40 = vector.load %arg6[%c0_41, %c0_42, %c0_43] : memref<3x16x16xf32, #tpu.memory_space<vmem>>, vector<1x16x16xf32>
    %41 = vector.shape_cast %40 : vector<1x16x16xf32> to vector<16x16xf32>
    %cst_44 = arith.constant dense<0.000000e+00> : vector<16x128xf32>
    %42 = tpu.matmul %41, %39, %cst_44 {dimension_numbers = #tpu.dot_dimension_numbers<[1], [0], [0], [1], [0, 0, 1, 1], [], []>} : vector<16x16xf32>, vector<16x128xf32>, vector<16x128xf32> -> vector<16x128xf32>
    %c0_45 = arith.constant 0 : index
    %c0_46 = arith.constant 0 : index
    %c0_47 = arith.constant 0 : index
    %43 = vector.load %arg7[%c0_45, %c0_46, %c0_47] : memref<3x128x32xf32, #tpu.memory_space<vmem>>, vector<1x128x32xf32>
    %44 = vector.shape_cast %43 : vector<1x128x32xf32> to vector<128x32xf32>
    %cst_48 = arith.constant dense<0.000000e+00> : vector<16x32xf32>
    %45 = tpu.matmul %42, %44, %cst_48 {dimension_numbers = #tpu.dot_dimension_numbers<[1], [0], [0], [1], [0, 0, 1, 1], [], []>} : vector<16x128xf32>, vector<128x32xf32>, vector<16x32xf32> -> vector<16x32xf32>
    %c1_49 = arith.constant 1 : index
    %c0_50 = arith.constant 0 : index
    %c0_51 = arith.constant 0 : index
    %46 = vector.load %arg6[%c1_49, %c0_50, %c0_51] : memref<3x16x16xf32, #tpu.memory_space<vmem>>, vector<1x16x16xf32>
    %47 = vector.shape_cast %46 : vector<1x16x16xf32> to vector<16x16xf32>
    %cst_52 = arith.constant dense<0.000000e+00> : vector<16x128xf32>
    %48 = tpu.matmul %47, %39, %cst_52 {dimension_numbers = #tpu.dot_dimension_numbers<[1], [0], [0], [1], [0, 0, 1, 1], [], []>} : vector<16x16xf32>, vector<16x128xf32>, vector<16x128xf32> -> vector<16x128xf32>
    %c1_53 = arith.constant 1 : index
    %c0_54 = arith.constant 0 : index
    %c0_55 = arith.constant 0 : index
    %49 = vector.load %arg7[%c1_53, %c0_54, %c0_55] : memref<3x128x32xf32, #tpu.memory_space<vmem>>, vector<1x128x32xf32>
    %50 = vector.shape_cast %49 : vector<1x128x32xf32> to vector<128x32xf32>
    %cst_56 = arith.constant dense<0.000000e+00> : vector<16x32xf32>
    %51 = tpu.matmul %48, %50, %cst_56 {dimension_numbers = #tpu.dot_dimension_numbers<[1], [0], [0], [1], [0, 0, 1, 1], [], []>} : vector<16x128xf32>, vector<128x32xf32>, vector<16x32xf32> -> vector<16x32xf32>
    %52 = arith.addf %45, %51 : vector<16x32xf32>
    %c2_57 = arith.constant 2 : index
    %c0_58 = arith.constant 0 : index
    %c0_59 = arith.constant 0 : index
    %53 = vector.load %arg6[%c2_57, %c0_58, %c0_59] : memref<3x16x16xf32, #tpu.memory_space<vmem>>, vector<1x16x16xf32>
    %54 = vector.shape_cast %53 : vector<1x16x16xf32> to vector<16x16xf32>
    %cst_60 = arith.constant dense<0.000000e+00> : vector<16x128xf32>
    %55 = tpu.matmul %54, %39, %cst_60 {dimension_numbers = #tpu.dot_dimension_numbers<[1], [0], [0], [1], [0, 0, 1, 1], [], []>} : vector<16x16xf32>, vector<16x128xf32>, vector<16x128xf32> -> vector<16x128xf32>
    %c2_61 = arith.constant 2 : index
    %c0_62 = arith.constant 0 : index
    %c0_63 = arith.constant 0 : index
    %56 = vector.load %arg7[%c2_61, %c0_62, %c0_63] : memref<3x128x32xf32, #tpu.memory_space<vmem>>, vector<1x128x32xf32>
    %57 = vector.shape_cast %56 : vector<1x128x32xf32> to vector<128x32xf32>
    %cst_64 = arith.constant dense<0.000000e+00> : vector<16x32xf32>
    %58 = tpu.matmul %55, %57, %cst_64 {dimension_numbers = #tpu.dot_dimension_numbers<[1], [0], [0], [1], [0, 0, 1, 1], [], []>} : vector<16x128xf32>, vector<128x32xf32>, vector<16x32xf32> -> vector<16x32xf32>
    %59 = arith.addf %52, %58 : vector<16x32xf32>
    %c0_65 = arith.constant 0 : index
    %c0_66 = arith.constant 0 : index
    %60 = vector.load %arg8[%c0_65, %c0_66] : memref<1x32xf32, #tpu.memory_space<vmem>>, vector<1x32xf32>
    %61 = vector.broadcast %60 : vector<1x32xf32> to vector<16x32xf32>
    %62 = arith.addf %59, %61 : vector<16x32xf32>
    %cst_67 = arith.constant 0.000000e+00 : f32
    %63 = vector.broadcast %cst_67 : f32 to vector<16x32xf32>
    %64 = arith.maximumf %62, %63 : vector<16x32xf32>
    %c0_68 = arith.constant 0 : index
    %c0_69 = arith.constant 0 : index
    %c0_70 = arith.constant 0 : index
    %65 = vector.load %arg9[%c0_68, %c0_69, %c0_70] : memref<2x8x16xf32, #tpu.memory_space<vmem>>, vector<1x8x16xf32>
    %66 = vector.shape_cast %65 : vector<1x8x16xf32> to vector<8x16xf32>
    %cst_71 = arith.constant dense<0.000000e+00> : vector<8x32xf32>
    %67 = tpu.matmul %66, %64, %cst_71 {dimension_numbers = #tpu.dot_dimension_numbers<[1], [0], [0], [1], [0, 0, 1, 1], [], []>} : vector<8x16xf32>, vector<16x32xf32>, vector<8x32xf32> -> vector<8x32xf32>
    %c1_72 = arith.constant 1 : index
    %c0_73 = arith.constant 0 : index
    %c0_74 = arith.constant 0 : index
    %68 = vector.load %arg9[%c1_72, %c0_73, %c0_74] : memref<2x8x16xf32, #tpu.memory_space<vmem>>, vector<1x8x16xf32>
    %69 = vector.shape_cast %68 : vector<1x8x16xf32> to vector<8x16xf32>
    %cst_75 = arith.constant dense<0.000000e+00> : vector<8x32xf32>
    %70 = tpu.matmul %69, %64, %cst_75 {dimension_numbers = #tpu.dot_dimension_numbers<[1], [0], [0], [1], [0, 0, 1, 1], [], []>} : vector<8x16xf32>, vector<16x32xf32>, vector<8x32xf32> -> vector<8x32xf32>
    %71 = arith.maximumf %67, %70 : vector<8x32xf32>
    %c0_76 = arith.constant 0 : index
    %c0_77 = arith.constant 0 : index
    %c0_78 = arith.constant 0 : index
    %72 = vector.load %arg10[%c0_76, %c0_77, %c0_78] : memref<2x32x16xf32, #tpu.memory_space<vmem>>, vector<1x32x16xf32>
    %73 = vector.shape_cast %72 : vector<1x32x16xf32> to vector<32x16xf32>
    %cst_79 = arith.constant dense<0.000000e+00> : vector<8x16xf32>
    %74 = tpu.matmul %71, %73, %cst_79 {dimension_numbers = #tpu.dot_dimension_numbers<[1], [0], [0], [1], [0, 0, 1, 1], [], []>} : vector<8x32xf32>, vector<32x16xf32>, vector<8x16xf32> -> vector<8x16xf32>
    %c1_80 = arith.constant 1 : index
    %c0_81 = arith.constant 0 : index
    %c0_82 = arith.constant 0 : index
    %75 = vector.load %arg10[%c1_80, %c0_81, %c0_82] : memref<2x32x16xf32, #tpu.memory_space<vmem>>, vector<1x32x16xf32>
    %76 = vector.shape_cast %75 : vector<1x32x16xf32> to vector<32x16xf32>
    %cst_83 = arith.constant dense<0.000000e+00> : vector<8x16xf32>
    %77 = tpu.matmul %71, %76, %cst_83 {dimension_numbers = #tpu.dot_dimension_numbers<[1], [0], [0], [1], [0, 0, 1, 1], [], []>} : vector<8x32xf32>, vector<32x16xf32>, vector<8x16xf32> -> vector<8x16xf32>
    %78 = arith.maximumf %74, %77 : vector<8x16xf32>
    %c0_84 = arith.constant 0 : index
    %c0_85 = arith.constant 0 : index
    %c0_86 = arith.constant 0 : index
    %79 = vector.load %arg11[%c0_84, %c0_85, %c0_86] : memref<2x16x8xf32, #tpu.memory_space<vmem>>, vector<1x16x8xf32>
    %80 = vector.shape_cast %79 : vector<1x16x8xf32> to vector<16x8xf32>
    %c0_87 = arith.constant 0 : index
    %c0_88 = arith.constant 0 : index
    %c0_89 = arith.constant 0 : index
    %81 = vector.load %arg12[%c0_87, %c0_88, %c0_89] : memref<2x16x128xf32, #tpu.memory_space<vmem>>, vector<1x16x128xf32>
    %82 = vector.shape_cast %81 : vector<1x16x128xf32> to vector<16x128xf32>
    %cst_90 = arith.constant dense<0.000000e+00> : vector<8x128xf32>
    %83 = tpu.matmul %78, %82, %cst_90 {dimension_numbers = #tpu.dot_dimension_numbers<[1], [0], [0], [1], [0, 0, 1, 1], [], []>} : vector<8x16xf32>, vector<16x128xf32>, vector<8x128xf32> -> vector<8x128xf32>
    %cst_91 = arith.constant dense<0.000000e+00> : vector<16x128xf32>
    %84 = tpu.matmul %80, %83, %cst_91 {dimension_numbers = #tpu.dot_dimension_numbers<[1], [0], [0], [1], [0, 0, 1, 1], [], []>} : vector<16x8xf32>, vector<8x128xf32>, vector<16x128xf32> -> vector<16x128xf32>
    %c1_92 = arith.constant 1 : index
    %c0_93 = arith.constant 0 : index
    %c0_94 = arith.constant 0 : index
    %85 = vector.load %arg11[%c1_92, %c0_93, %c0_94] : memref<2x16x8xf32, #tpu.memory_space<vmem>>, vector<1x16x8xf32>
    %86 = vector.shape_cast %85 : vector<1x16x8xf32> to vector<16x8xf32>
    %c1_95 = arith.constant 1 : index
    %c0_96 = arith.constant 0 : index
    %c0_97 = arith.constant 0 : index
    %87 = vector.load %arg12[%c1_95, %c0_96, %c0_97] : memref<2x16x128xf32, #tpu.memory_space<vmem>>, vector<1x16x128xf32>
    %88 = vector.shape_cast %87 : vector<1x16x128xf32> to vector<16x128xf32>
    %cst_98 = arith.constant dense<0.000000e+00> : vector<8x128xf32>
    %89 = tpu.matmul %78, %88, %cst_98 {dimension_numbers = #tpu.dot_dimension_numbers<[1], [0], [0], [1], [0, 0, 1, 1], [], []>} : vector<8x16xf32>, vector<16x128xf32>, vector<8x128xf32> -> vector<8x128xf32>
    %cst_99 = arith.constant dense<0.000000e+00> : vector<16x128xf32>
    %90 = tpu.matmul %86, %89, %cst_99 {dimension_numbers = #tpu.dot_dimension_numbers<[1], [0], [0], [1], [0, 0, 1, 1], [], []>} : vector<16x8xf32>, vector<8x128xf32>, vector<16x128xf32> -> vector<16x128xf32>
    %91 = arith.addf %84, %90 : vector<16x128xf32>
    %c0_100 = arith.constant 0 : index
    %c0_101 = arith.constant 0 : index
    %92 = vector.load %arg13[%c0_100, %c0_101] : memref<1x128xf32, #tpu.memory_space<vmem>>, vector<1x128xf32>
    %93 = vector.broadcast %92 : vector<1x128xf32> to vector<16x128xf32>
    %94 = arith.addf %91, %93 : vector<16x128xf32>
    %cst_102 = arith.constant 0.000000e+00 : f32
    %95 = vector.broadcast %cst_102 : f32 to vector<16x128xf32>
    %96 = arith.maximumf %94, %95 : vector<16x128xf32>
    %c0_103 = arith.constant 0 : index
    %c0_104 = arith.constant 0 : index
    %c0_105 = arith.constant 0 : index
    %97 = vector.load %arg14[%c0_103, %c0_104, %c0_105] : memref<2x32x16xf32, #tpu.memory_space<vmem>>, vector<1x32x16xf32>
    %98 = vector.shape_cast %97 : vector<1x32x16xf32> to vector<32x16xf32>
    %c0_106 = arith.constant 0 : index
    %c0_107 = arith.constant 0 : index
    %c0_108 = arith.constant 0 : index
    %99 = vector.load %arg15[%c0_106, %c0_107, %c0_108] : memref<2x128x16xf32, #tpu.memory_space<vmem>>, vector<1x128x16xf32>
    %100 = vector.shape_cast %99 : vector<1x128x16xf32> to vector<128x16xf32>
    %cst_109 = arith.constant dense<0.000000e+00> : vector<16x16xf32>
    %101 = tpu.matmul %96, %100, %cst_109 {dimension_numbers = #tpu.dot_dimension_numbers<[1], [0], [0], [1], [0, 0, 1, 1], [], []>} : vector<16x128xf32>, vector<128x16xf32>, vector<16x16xf32> -> vector<16x16xf32>
    %cst_110 = arith.constant dense<0.000000e+00> : vector<32x16xf32>
    %102 = tpu.matmul %98, %101, %cst_110 {dimension_numbers = #tpu.dot_dimension_numbers<[1], [0], [0], [1], [0, 0, 1, 1], [], []>} : vector<32x16xf32>, vector<16x16xf32>, vector<32x16xf32> -> vector<32x16xf32>
    %c1_111 = arith.constant 1 : index
    %c0_112 = arith.constant 0 : index
    %c0_113 = arith.constant 0 : index
    %103 = vector.load %arg14[%c1_111, %c0_112, %c0_113] : memref<2x32x16xf32, #tpu.memory_space<vmem>>, vector<1x32x16xf32>
    %104 = vector.shape_cast %103 : vector<1x32x16xf32> to vector<32x16xf32>
    %c1_114 = arith.constant 1 : index
    %c0_115 = arith.constant 0 : index
    %c0_116 = arith.constant 0 : index
    %105 = vector.load %arg15[%c1_114, %c0_115, %c0_116] : memref<2x128x16xf32, #tpu.memory_space<vmem>>, vector<1x128x16xf32>
    %106 = vector.shape_cast %105 : vector<1x128x16xf32> to vector<128x16xf32>
    %cst_117 = arith.constant dense<0.000000e+00> : vector<16x16xf32>
    %107 = tpu.matmul %96, %106, %cst_117 {dimension_numbers = #tpu.dot_dimension_numbers<[1], [0], [0], [1], [0, 0, 1, 1], [], []>} : vector<16x128xf32>, vector<128x16xf32>, vector<16x16xf32> -> vector<16x16xf32>
    %cst_118 = arith.constant dense<0.000000e+00> : vector<32x16xf32>
    %108 = tpu.matmul %104, %107, %cst_118 {dimension_numbers = #tpu.dot_dimension_numbers<[1], [0], [0], [1], [0, 0, 1, 1], [], []>} : vector<32x16xf32>, vector<16x16xf32>, vector<32x16xf32> -> vector<32x16xf32>
    %109 = arith.addf %102, %108 : vector<32x16xf32>
    %c0_119 = arith.constant 0 : index
    %c0_120 = arith.constant 0 : index
    %110 = vector.load %arg16[%c0_119, %c0_120] : memref<1x16xf32, #tpu.memory_space<vmem>>, vector<1x16xf32>
    %111 = vector.broadcast %110 : vector<1x16xf32> to vector<32x16xf32>
    %112 = arith.addf %109, %111 : vector<32x16xf32>
    %113 = math.absf %112 : vector<32x16xf32>
    %cst_121 = arith.constant 0.000000e+00 : f32
    %114 = vector.broadcast %cst_121 : f32 to vector<32x16xf32>
    %115 = arith.subf %114, %113 : vector<32x16xf32>
    %116 = math.exp %115 : vector<32x16xf32>
    %cst_122 = arith.constant 1.000000e+00 : f32
    %117 = vector.broadcast %cst_122 : f32 to vector<32x16xf32>
    %118 = arith.addf %117, %116 : vector<32x16xf32>
    %cst_123 = arith.constant 1.000000e+00 : f32
    %119 = vector.broadcast %cst_123 : f32 to vector<32x16xf32>
    %120 = arith.divf %119, %118 : vector<32x16xf32>
    %cst_124 = arith.constant 0.000000e+00 : f32
    %121 = vector.broadcast %cst_124 : f32 to vector<32x16xf32>
    %122 = arith.cmpf oge, %112, %121 : vector<32x16xf32>
    %123 = arith.mulf %116, %120 : vector<32x16xf32>
    %124 = arith.select %122, %120, %123 : vector<32x16xi1>, vector<32x16xf32>
    %c0_125 = arith.constant 0 : index
    %c0_126 = arith.constant 0 : index
    %125 = vector.load %arg17[%c0_125, %c0_126] : memref<32x16xf32, #tpu.memory_space<vmem>>, vector<32x16xf32>
    tpu.vector_store %arg17[%c0_125, %c0_126], %124 {strides = array<i32>} : memref<32x16xf32, #tpu.memory_space<vmem>>, vector<32x16xf32>,
    return
  }
}

</mosaic_0001>

<bundles_post_ra>
// kernel: tile.23
= control target key start
LH: loop header
LB: loop body
LE: loop exit
PB: predicated region body
PF: predicated region fallthrough
CT: control target
= control target key end

     0   :  { %s28_s0 = inlined_call_operand.vmem [shape: f32[16], index: 0, kind: input, shape index: {}]   ;;  %s29_s1 = inlined_call_operand.vmem [shape: f32[16,16], index: 1, kind: output, shape index: {}]  }
   0x1   :  { %v4_v0 = vld [vmem:[%s28_s0] ss:$0 sm:$0xff] }
   0x2   :  { %5 = vst [vmem:[%s29_s1] sm:$0xff] %v4_v0  ;;  %8 = vst [vmem:[%s29_s1 + $0x8] sm:$0xff] %v4_v0 }

// kernel: tile.24
= control target key start
LH: loop header
LB: loop body
LE: loop exit
PB: predicated region body
PF: predicated region fallthrough
CT: control target
= control target key end

     0   :  { %s7_s6 = smov 3  ;;  %s21_s9 = smov 3  ;;  %vm4_vm0 = vcmask 130048   ;;  %vm11_vm1 = vcmask 1048448   ;;  %vm18_vm2 = vcmask 917248   ;;  %vm25_vm3 = vcmask 786048   ;;  %s131_s0 = inlined_call_operand.vmem [shape: f32[16,16], index: 0, kind: input, shape index: {}]   ;;  %s132_s1 = inlined_call_operand.vmem [shape: f32[1,256], index: 1, kind: output, shape index: {}]  }
   0x1   :  { %v69_v0 = vld [vmem:[%s131_s0 + $0x7] ss:$8 sm:%s7_s6]   ;;  %s84_s10 = smov 112   ;;  %v71_v1 = vld [vmem:[%s131_s0 + $0x5] ss:$8 sm:%s21_s9]   ;;  %s14_s13 = smov 3 }
   0x2   :  { %9 = vrot.lane.b32.xlu0 %v69_v0, %s84_s10  ;;  %s85_s14 = smov 80   ;;  %v70_v2 = vld [vmem:[%s131_s0 + $0x6] ss:$8 sm:%s14_s13]   ;;  %s28_s17 = smov 3  ;;  %vm32_vm4 = vcmask 654848   ;;  %vm39_vm5 = vcmask 523648  }
   0x3   :  { %23 = vrot.lane.b32.xlu1 %v71_v1, %s85_s14  ;;  %v72_v3 = vld [vmem:[%s131_s0 + $0x4] ss:$8 sm:%s28_s17]   ;;  %s35_s20 = smov 3  ;;  %s42_s21 = smov 3  ;;  %vm46_vm6 = vcmask 392448   ;;  %vm53_vm7 = vcmask 261248  }
   0x4   :  { %s86_s22 = smov 96   ;;  %s87_s23 = smov 64   ;;  %v73_v4 = vld [vmem:[%s131_s0 + $0x3] ss:$8 sm:%s35_s20]   ;;  %v74_v5 = vld [vmem:[%s131_s0 + $0x2] ss:$8 sm:%s42_s21]  }
   0x5   :  { %s2_s26 = smov 3  ;;  %s49_s29 = smov 3 }
   0x6   :  { %16 = vrot.lane.b32.xlu0 %v70_v2, %s86_s22  ;;  %v3_v6 = vld [vmem:[%s131_s0] ss:$8 sm:%s2_s26]   ;;  %s88_s3 = smov 48   ;;  %s89_s4 = smov 32  }
   0x7   :  { %30 = vrot.lane.b32.xlu1 %v72_v3, %s87_s23  ;;  %5 = vst.msk [vmem:[#allocation0] ss:$8 sm:$0x3] %vm4_vm0, %v3_v6   ;;  %v75_v7 = vld [vmem:[%s131_s0 + $0x1] ss:$8 sm:%s49_s29]   ;;  %s90_s0 = smov 16  }
   0xa   :  { %37 = vrot.lane.b32.xlu0 %v73_v4, %s88_s3 }
   0xb   :  { %44 = vrot.lane.b32.xlu1 %v74_v5, %s89_s4 }
   0xe   :  { %51 = vrot.lane.b32.xlu0 %v75_v7, %s90_s0 }
  0x74   :  { %v10_v8 = vpop.permute.xlu0 %9  }
  0x75   :  { %12 = vst.msk [vmem:[#allocation0] ss:$8 sm:$0x3] %vm11_vm1, %v10_v8   ;;  %v24_v9 = vpop.permute.xlu1 %23  }
  0x78   :  { %v17_v10 = vpop.permute.xlu0 %16  }
  0x79   :  { %19 = vst.msk [vmem:[#allocation0] ss:$8 sm:$0x3] %vm18_vm2, %v17_v10   ;;  %v31_v11 = vpop.permute.xlu1 %30  }
  0x7a   :  { %26 = vst.msk [vmem:[#allocation0] ss:$8 sm:$0x3] %vm25_vm3, %v24_v9  }
  0x7b   :  { %33 = vst.msk [vmem:[#allocation0] ss:$8 sm:$0x3] %vm32_vm4, %v31_v11  }
  0x7c   :  { %v38_v12 = vpop.permute.xlu0 %37  }
  0x7d   :  { %40 = vst.msk [vmem:[#allocation0] ss:$8 sm:$0x3] %vm39_vm5, %v38_v12   ;;  %v45_v13 = vpop.permute.xlu1 %44  }
  0x7e   :  { %47 = vst.msk [vmem:[#allocation0] ss:$8 sm:$0x3] %vm46_vm6, %v45_v13  }
  0x80   :  { %v52_v14 = vpop.permute.xlu0 %51  }
  0x81   :  { %54 = vst.msk [vmem:[#allocation0] ss:$8 sm:$0x3] %vm53_vm7, %v52_v14  }
  0x88   :  { %v59_v15 = vld [vmem:[#allocation0] sm:$0x1]  ;;  %v64_v16 = vld [vmem:[#allocation0 + $0x8] sm:$0x1] }
  0x89   :  { %62 = vst [vmem:[%s132_s1] sm:$0x1] %v59_v15  ;;  %76 = vst [vmem:[%s132_s1 + $0x1] sm:$0x1] %v64_v16 }

// kernel: tile.28
= control target key start
LH: loop header
LB: loop body
LE: loop exit
PB: predicated region body
PF: predicated region fallthrough
CT: control target
= control target key end

     0   :  { %s22_s0 = inlined_call_operand.vmem [shape: f32[4], index: 0, kind: input, shape index: {}]   ;;  %s23_s1 = inlined_call_operand.vmem [shape: f32[8,4], index: 1, kind: output, shape index: {}]  }
   0x1   :  { %v4_v0 = vld [vmem:[%s22_s0] ss:$0 sm:$0xff] }
   0x2   :  { %5 = vst [vmem:[%s23_s1] sm:$0xff] %v4_v0 }

// kernel: tile.29
= control target key start
LH: loop header
LB: loop body
LE: loop exit
PB: predicated region body
PF: predicated region fallthrough
CT: control target
= control target key end

     0   :  { %s69_s10 = smov 28   ;;  %s70_s11 = smov 20   ;;  %vm3_vm0 = vcmask 31744   ;;  %vm9_vm1 = vcmask 261344   ;;  %vm15_vm2 = vcmask 228544   ;;  %vm21_vm3 = vcmask 195744   ;;  %s113_s0 = inlined_call_operand.vmem [shape: f32[8,4], index: 0, kind: input, shape index: {}]   ;;  %s114_s1 = inlined_call_operand.vmem [shape: f32[1,32], index: 1, kind: output, shape index: {}]  }
   0x1   :  { %v55_v0 = vld [vmem:[%s113_s0 + $0x7] sm:$0x1]   ;;  %v57_v1 = vld [vmem:[%s113_s0 + $0x5] sm:$0x1]   ;;  %v56_v2 = vld [vmem:[%s113_s0 + $0x6] sm:$0x1]  }
   0x2   :  { %7 = vrot.lane.b32.xlu0 %v55_v0, %s69_s10  ;;  %19 = vrot.lane.b32.xlu1 %v57_v1, %s70_s11  ;;  %v58_v3 = vld [vmem:[%s113_s0 + $0x4] sm:$0x1]   ;;  %v2_v4 = vld [vmem:[%s113_s0] sm:$0x1]   ;;  %s71_s18 = smov 24   ;;  %s72_s19 = smov 16  }
   0x3   :  { %4 = vst.msk [vmem:[#allocation0] sm:$0x1] %vm3_vm0, %v2_v4   ;;  %v59_v5 = vld [vmem:[%s113_s0 + $0x3] sm:$0x1]   ;;  %v60_v6 = vld [vmem:[%s113_s0 + $0x2] sm:$0x1]  }
   0x4   :  { %s73_s24 = smov 12   ;;  %s74_s25 = smov 8   ;;  %v61_v7 = vld [vmem:[%s113_s0 + $0x1] sm:$0x1]   ;;  %vm27_vm4 = vcmask 162944   ;;  %vm33_vm5 = vcmask 130144  }
   0x5   :  { %s75_s0 = smov 4   ;;  %vm39_vm6 = vcmask 97344   ;;  %vm45_vm7 = vcmask 64544  }
   0x6   :  { %13 = vrot.lane.b32.xlu0 %v56_v2, %s71_s18  ;;  %25 = vrot.lane.b32.xlu1 %v58_v3, %s72_s19 }
   0xa   :  { %31 = vrot.lane.b32.xlu0 %v59_v5, %s73_s24  ;;  %37 = vrot.lane.b32.xlu1 %v60_v6, %s74_s25 }
   0xe   :  { %43 = vrot.lane.b32.xlu0 %v61_v7, %s75_s0 }
  0x74   :  { %v8_v8 = vpop.permute.xlu0 %7   ;;  %v20_v9 = vpop.permute.xlu1 %19  }
  0x75   :  { %10 = vst.msk [vmem:[#allocation0] sm:$0x1] %vm9_vm1, %v8_v8  }
  0x78   :  { %v14_v10 = vpop.permute.xlu0 %13   ;;  %v26_v11 = vpop.permute.xlu1 %25  }
  0x79   :  { %16 = vst.msk [vmem:[#allocation0] sm:$0x1] %vm15_vm2, %v14_v10  }
  0x7a   :  { %22 = vst.msk [vmem:[#allocation0] sm:$0x1] %vm21_vm3, %v20_v9  }
  0x7b   :  { %28 = vst.msk [vmem:[#allocation0] sm:$0x1] %vm27_vm4, %v26_v11  }
  0x7c   :  { %v32_v12 = vpop.permute.xlu0 %31   ;;  %v38_v13 = vpop.permute.xlu1 %37  }
  0x7d   :  { %34 = vst.msk [vmem:[#allocation0] sm:$0x1] %vm33_vm5, %v32_v12  }
  0x7e   :  { %40 = vst.msk [vmem:[#allocation0] sm:$0x1] %vm39_vm6, %v38_v13  }
  0x80   :  { %v44_v14 = vpop.permute.xlu0 %43  }
  0x81   :  { %46 = vst.msk [vmem:[#allocation0] sm:$0x1] %vm45_vm7, %v44_v14  }
  0x88   :  { %v51_v15 = vld [vmem:[#allocation0] sm:$0x1] }
  0x89   :  { %54 = vst [vmem:[%s114_s1] sm:$0x1] %v51_v15 }

// kernel: tile.33
= control target key start
LH: loop header
LB: loop body
LE: loop exit
PB: predicated region body
PF: predicated region fallthrough
CT: control target
= control target key end

     0   :  { %s22_s0 = inlined_call_operand.vmem [shape: f32[16], index: 0, kind: input, shape index: {}]   ;;  %s23_s1 = inlined_call_operand.vmem [shape: f32[8,16], index: 1, kind: output, shape index: {}]  }
   0x1   :  { %v4_v0 = vld [vmem:[%s22_s0] ss:$0 sm:$0xff] }
   0x2   :  { %5 = vst [vmem:[%s23_s1] sm:$0xff] %v4_v0 }

// kernel: tile.34
= control target key start
LH: loop header
LB: loop body
LE: loop exit
PB: predicated region body
PF: predicated region fallthrough
CT: control target
= control target key end

     0   :  { %s69_s10 = smov 112   ;;  %s70_s11 = smov 80   ;;  %vm3_vm0 = vcmask 130048   ;;  %vm9_vm1 = vcmask 1048448   ;;  %vm15_vm2 = vcmask 917248   ;;  %vm21_vm3 = vcmask 786048   ;;  %s113_s0 = inlined_call_operand.vmem [shape: f32[8,16], index: 0, kind: input, shape index: {}]   ;;  %s114_s1 = inlined_call_operand.vmem [shape: f32[1,128], index: 1, kind: output, shape index: {}]  }
   0x1   :  { %v55_v0 = vld [vmem:[%s113_s0 + $0x7] sm:$0x1]   ;;  %v57_v1 = vld [vmem:[%s113_s0 + $0x5] sm:$0x1]   ;;  %v56_v2 = vld [vmem:[%s113_s0 + $0x6] sm:$0x1]  }
   0x2   :  { %7 = vrot.lane.b32.xlu0 %v55_v0, %s69_s10  ;;  %19 = vrot.lane.b32.xlu1 %v57_v1, %s70_s11  ;;  %v58_v3 = vld [vmem:[%s113_s0 + $0x4] sm:$0x1]   ;;  %v2_v4 = vld [vmem:[%s113_s0] sm:$0x1]   ;;  %s71_s18 = smov 96   ;;  %s72_s19 = smov 64  }
   0x3   :  { %4 = vst.msk [vmem:[#allocation0] sm:$0x1] %vm3_vm0, %v2_v4   ;;  %v59_v5 = vld [vmem:[%s113_s0 + $0x3] sm:$0x1]   ;;  %v60_v6 = vld [vmem:[%s113_s0 + $0x2] sm:$0x1]  }
   0x4   :  { %s73_s24 = smov 48   ;;  %s74_s25 = smov 32   ;;  %v61_v7 = vld [vmem:[%s113_s0 + $0x1] sm:$0x1]   ;;  %vm27_vm4 = vcmask 654848   ;;  %vm33_vm5 = vcmask 523648  }
   0x5   :  { %s75_s0 = smov 16   ;;  %vm39_vm6 = vcmask 392448   ;;  %vm45_vm7 = vcmask 261248  }
   0x6   :  { %13 = vrot.lane.b32.xlu0 %v56_v2, %s71_s18  ;;  %25 = vrot.lane.b32.xlu1 %v58_v3, %s72_s19 }
   0xa   :  { %31 = vrot.lane.b32.xlu0 %v59_v5, %s73_s24  ;;  %37 = vrot.lane.b32.xlu1 %v60_v6, %s74_s25 }
   0xe   :  { %43 = vrot.lane.b32.xlu0 %v61_v7, %s75_s0 }
  0x74   :  { %v8_v8 = vpop.permute.xlu0 %7   ;;  %v20_v9 = vpop.permute.xlu1 %19  }
  0x75   :  { %10 = vst.msk [vmem:[#allocation0] sm:$0x1] %vm9_vm1, %v8_v8  }
  0x78   :  { %v14_v10 = vpop.permute.xlu0 %13   ;;  %v26_v11 = vpop.permute.xlu1 %25  }
  0x79   :  { %16 = vst.msk [vmem:[#allocation0] sm:$0x1] %vm15_vm2, %v14_v10  }
  0x7a   :  { %22 = vst.msk [vmem:[#allocation0] sm:$0x1] %vm21_vm3, %v20_v9  }
  0x7b   :  { %28 = vst.msk [vmem:[#allocation0] sm:$0x1] %vm27_vm4, %v26_v11  }
  0x7c   :  { %v32_v12 = vpop.permute.xlu0 %31   ;;  %v38_v13 = vpop.permute.xlu1 %37  }
  0x7d   :  { %34 = vst.msk [vmem:[#allocation0] sm:$0x1] %vm33_vm5, %v32_v12  }
  0x7e   :  { %40 = vst.msk [vmem:[#allocation0] sm:$0x1] %vm39_vm6, %v38_v13  }
  0x80   :  { %v44_v14 = vpop.permute.xlu0 %43  }
  0x81   :  { %46 = vst.msk [vmem:[#allocation0] sm:$0x1] %vm45_vm7, %v44_v14  }
  0x88   :  { %v51_v15 = vld [vmem:[#allocation0] sm:$0x1] }
  0x89   :  { %54 = vst [vmem:[%s114_s1] sm:$0x1] %v51_v15 }

// kernel: model_forward.1
= control target key start
LH: loop header
LB: loop body
LE: loop exit
PB: predicated region body
PF: predicated region fallthrough
CT: control target
= control target key end

     0   :  { %s4418_s0 = inlined_call_operand.vmem [shape: f32[32,16], index: 0, kind: input, shape index: {}]   ;;  %s4419_s1 = inlined_call_operand.vmem [shape: f32[3,32,32], index: 1, kind: input, shape index: {}]   ;;  %s4420_s2 = inlined_call_operand.vmem [shape: f32[3,16,256], index: 2, kind: input, shape index: {}]   ;;  %s4421_s3 = inlined_call_operand.vmem [shape: f32[1,256], index: 3, kind: input, shape index: {}]   ;;  %s4422_s4 = inlined_call_operand.vmem [shape: f32[2,16,32], index: 4, kind: input, shape index: {}]   ;;  %s4423_s5 = inlined_call_operand.vmem [shape: f32[2,256,128], index: 5, kind: input, shape index: {}]   ;;  %s4424_s6 = inlined_call_operand.vmem [shape: f32[3,16,16], index: 6, kind: input, shape index: {}]   ;;  %s4425_s7 = inlined_call_operand.vmem [shape: f32[3,128,32], index: 7, kind: input, shape index: {}]   ;;  %s4426_s8 = inlined_call_operand.vmem [shape: f32[1,32], index: 8, kind: input, shape index: {}]   ;;  %s4427_s9 = inlined_call_operand.vmem [shape: f32[2,8,16], index: 9, kind: input, shape index: {}]   ;;  %s4428_s10 = inlined_call_operand.vmem [shape: f32[2,32,16], index: 10, kind: input, shape index: {}]   ;;  %s4429_s11 = inlined_call_operand.vmem [shape: f32[2,16,8], index: 11, kind: input, shape index: {}]   ;;  %s4430_s12 = inlined_call_operand.vmem [shape: f32[2,16,128], index: 12, kind: input, shape index: {}]   ;;  %s4431_s13 = inlined_call_operand.vmem [shape: f32[1,128], index: 13, kind: input, shape index: {}]   ;;  %s4432_s14 = inlined_call_operand.vmem [shape: f32[2,32,16], index: 14, kind: input, shape index: {}]   ;;  %s4433_s15 = inlined_call_operand.vmem [shape: f32[2,128,16], index: 15, kind: input, shape index: {}]   ;;  %s4434_s16 = inlined_call_operand.vmem [shape: f32[1,16], index: 16, kind: input, shape index: {}]   ;;  %s4435_s17 = inlined_call_operand.hbm [shape: f32[32,16], index: 17, kind: output, shape index: {}]  }
   0x1   :  { %4438 = sst [smem:[#allocation5_spill]] %s4418_s0 }
   0x2   :  { %4439 = sst [smem:[#allocation6_spill]] %s4419_s1 }
   0x3   :  { %s4440_s26 = sld [smem:[#allocation5_spill]] }
   0x9   :  { %v3610_v0 = vld [vmem:[%s4440_s26 + $0x18] sm:$0xff]  ;;  %v3615_v1 = vld [vmem:[%s4440_s26 + $0x10] sm:$0xff]  ;;  %v3624_v2 = vld [vmem:[%s4440_s26 + $0x8] sm:$0xff] }
   0xa   :  { %3151 = vmatprep.subr.mxu0 %v3610_v0  ;;  %3165 = vmatprep.subr.mxu1 %v3610_v0  ;;  %v3633_v3 = vld [vmem:[%s4440_s26] sm:$0xff] }
   0xb   :  { %3152 = vmatpush3.msra.mxu0 %v3610_v0  ;;  %3166 = vmatpush3.msra.mxu1 %v3610_v0 }
   0xc   :  { %3153 = vmatprep.subr.mxu0 %v3615_v1  ;;  %3167 = vmatprep.subr.mxu1 %v3615_v1 }
   0xd   :  { %3154 = vmatpush3.msra.mxu0 %v3615_v1  ;;  %3168 = vmatpush3.msra.mxu1 %v3615_v1 }
   0xe   :  { %22 = vsyncpa [#allocation3], 0  ;;  %3155 = vmatprep.subr.mxu0 %v3624_v2  ;;  %3169 = vmatprep.subr.mxu1 %v3624_v2  ;;  %s4441_s20 = sld [smem:[#allocation6_spill]]  ;;  %vm65_vm0 = vcmask 261120   ;;  %v2754_v10 = vld [vmem:[%s4420_s2 + $0x38] sm:$0xff]  ;;  %v2753_v14 = vld [vmem:[%s4420_s2 + $0x30] sm:$0xff] }
   0xf   :  { %3156 = vmatpush3.msra.mxu0 %v3624_v2  ;;  %3170 = vmatpush3.msra.mxu1 %v3624_v2  ;;  %v166_v11 = vld [vmem:[%s4420_s2 + $0x18] sm:$0xff]  ;;  %v165_v15 = vld [vmem:[%s4420_s2 + $0x10] sm:$0xff]  ;;  %v2752_v16 = vld [vmem:[%s4420_s2 + $0x28] sm:$0xff]  ;;  %v3512_v20 = vmov 0.0   ;;  %vm274_vm1 = vcmask 130048   ;;  %vm3513_vm2 = vmmov 0  }
  0x10   :  { %3157 = vmatprep.subr.mxu0 %v3633_v3  ;;  %3171 = vmatprep.subr.mxu1 %v3633_v3  ;;  %v164_v17 = vld [vmem:[%s4420_s2 + $0x8] sm:$0xff]  ;;  %v2751_v18 = vld [vmem:[%s4420_s2 + $0x20] sm:$0xff]  ;;  %v2774_v33 = vld [vmem:[%s4420_s2 + $0x58] sm:$0xff]  ;;  %vm2108_vm3 = vcmask 64512  }
  0x11   :  { %3158 = vmatpush3.msra.mxu0 %v3633_v3  ;;  %3172 = vmatpush3.msra.mxu1 %v3633_v3  ;;  %v163_v19 = vld [vmem:[%s4420_s2] sm:$0xff]  ;;  %v2773_v34 = vld [vmem:[%s4420_s2 + $0x50] sm:$0xff]  ;;  %v2772_v35 = vld [vmem:[%s4420_s2 + $0x48] sm:$0xff] }
  0x12   :  { %315 = vmatprep.subr.mxu0 %v2754_v10  ;;  %416 = vmatprep.subr.mxu1 %v166_v11  ;;  %v2771_v36 = vld [vmem:[%s4420_s2 + $0x40] sm:$0xff]  ;;  %v927_v49 = vld [vmem:[%s4423_s5 + $0xf8] sm:$0xff]  ;;  %v926_v51 = vld [vmem:[%s4423_s5 + $0xf0] sm:$0xff] }
  0x13   :  { %v911_v50 = vld [vmem:[%s4423_s5 + $0x78] sm:$0xff]  ;;  %v910_v52 = vld [vmem:[%s4423_s5 + $0x70] sm:$0xff]  ;;  %v925_v53 = vld [vmem:[%s4423_s5 + $0xe8] sm:$0xff] }
  0x14   :  { %v61_v4 = vld [vmem:[%s4441_s20] sm:$0xff]  ;;  %v62_v6 = vld [vmem:[%s4441_s20 + $0x8] sm:$0xff]  ;;  %v2745_v8 = vld [vmem:[%s4441_s20 + $0x30] sm:$0xff] }
  0x15   :  { %v2743_v5 = vld [vmem:[%s4441_s20 + $0x20] sm:$0xff]  ;;  %v2744_v7 = vld [vmem:[%s4441_s20 + $0x28] sm:$0xff]  ;;  %3159 = vmatprep.mubr.msk.f32.mxu0 %vm65_vm0, %v61_v4  ;;  %v63_v9 = vld [vmem:[%s4441_s20 + $0x10] sm:$0xff] }
  0x16   :  { %3173 = vmatprep.mubr.msk.f32.mxu1 %vm65_vm0, %v2743_v5  ;;  %3160 = vmatmul.mubr.msk.f32.vlgmr.msra.gmra.mxu0 %vm65_vm0, %v62_v6  ;;  %v2746_v12 = vld [vmem:[%s4441_s20 + $0x38] sm:$0xff]  ;;  %v2763_v29 = vld [vmem:[%s4441_s20 + $0x40] sm:$0xff]  ;;  %v2764_v30 = vld [vmem:[%s4441_s20 + $0x48] sm:$0xff] }
  0x17   :  { %3174 = vmatmul.mubr.msk.f32.vlgmr.msra.gmra.mxu1 %vm65_vm0, %v2744_v7  ;;  %3162 = vmatprep.mubr.msk.f32.mxu0 %vm65_vm0, %v63_v9  ;;  %v64_v13 = vld [vmem:[%s4441_s20 + $0x18] sm:$0xff]  ;;  %v2765_v31 = vld [vmem:[%s4441_s20 + $0x50] sm:$0xff]  ;;  %v909_v54 = vld [vmem:[%s4423_s5 + $0x68] sm:$0xff] }
  0x18   :  { %3176 = vmatprep.mubr.msk.f32.mxu1 %vm65_vm0, %v2745_v8  ;;  %316 = vmatpush1.msra.mxu0 %v2753_v14  ;;  %v2766_v32 = vld [vmem:[%s4441_s20 + $0x58] sm:$0xff]  ;;  %v924_v55 = vld [vmem:[%s4423_s5 + $0xe0] sm:$0xff]  ;;  %v922_v59 = vld [vmem:[%s4423_s5 + $0xd0] sm:$0xff] }
  0x19   :  { %417 = vmatpush1.msra.mxu1 %v165_v15  ;;  %317 = vmatprep.subr.mxu0 %v2752_v16  ;;  %v908_v56 = vld [vmem:[%s4423_s5 + $0x60] sm:$0xff]  ;;  %v923_v57 = vld [vmem:[%s4423_s5 + $0xd8] sm:$0xff]  ;;  %v906_v60 = vld [vmem:[%s4423_s5 + $0x50] sm:$0xff] }
  0x1a   :  { %3163 = vmatmul.mubr.msk.f32.gmra.mxu0 %vm65_vm0, %v64_v13  ;;  %418 = vmatprep.subr.mxu1 %v164_v17  ;;  %v907_v58 = vld [vmem:[%s4423_s5 + $0x58] sm:$0xff]  ;;  %v921_v61 = vld [vmem:[%s4423_s5 + $0xc8] sm:$0xff]  ;;  %v920_v63 = vld [vmem:[%s4423_s5 + $0xc0] sm:$0xff] }
  0x1b   :  { %3177 = vmatmul.mubr.msk.f32.gmra.mxu1 %vm65_vm0, %v2746_v12  ;;  %318 = vmatpush1.msra.mxu0 %v2751_v18  ;;  %v905_v62 = vld [vmem:[%s4423_s5 + $0x48] sm:$0xff]  ;;  %v695_v12 = vlaneseq }
  0x1c   :  { %351 = vmatprep.mubr.f32.mxu0 %v3512_v20  ;;  %419 = vmatpush1.msra.mxu1 %v163_v19 }
  0x1d   :  { %452 = vmatprep.mubr.f32.mxu1 %v3512_v20  ;;  %3179 = vmatprep.subr.mxu0 %v3610_v0  ;;  %v696_v15 = vshrl.u32 %v695_v12, 7  ;;  %v2794_v12 = vld [vmem:[%s4423_s5 + $0x148] sm:$0xff] }
  0x1e   :  { %624 = vmatprep.subr.mxu1 %v2774_v33 }
  0x1f   :  { %v697_v18 = vsub.s32 0, %v696_v15 }
  0xd6   :  { %v3161_v21 = vpop.f32.mrf.mxu0 }
  0xd7   :  { %v3175_v22 = vpop.f32.mrf.mxu1 }
  0xd8   :  { %v144_v23 = vpop.f32.mrf.mxu0 }
  0xd9   :  { %v250_v24 = vpop.f32.mrf.mxu1  ;;  %2759 = vmatmul.mubr.msk.f32.vlgmr.msra.gmra.mxu1 %vm274_vm1, %v144_v23  ;;  %v693_v23 = vld [vmem:[%s4421_s3] sm:$0x3] }
  0xda   :  { %2755 = vmatmul.mubr.msk.f32.vlgmr.msra.gmra.mxu0 %vm274_vm1, %v250_v24  ;;  %458 = vmatprep.mubr.f32.mxu1 %v3512_v20  ;;  %v3164_v25 = vpop.f32.mrf.mxu0  ;;  %v701_v24 = vsub.s32 1, %v696_v15  ;;  %v2808_v15 = vld [vmem:[%s4423_s5 + $0x1b8] sm:$0xff] }
  0xdb   :  { %357 = vmatprep.mubr.f32.mxu0 %v3512_v20  ;;  %3180 = vmatpush3.msra.mxu0 %v3610_v0  ;;  %v3178_v26 = vpop.f32.mrf.mxu1  ;;  %v904_v0 = vld [vmem:[%s4423_s5 + $0x40] sm:$0xff] }
  0xdc   :  { %3181 = vmatprep.subr.mxu0 %v3615_v1  ;;  %v154_v27 = vpop.f32.mrf.mxu0  ;;  %625 = vmatpush1.msra.mxu1 %v2773_v34 }
  0xdd   :  { %2760 = vmatmul.mubr.msk.f32.gmra.mxu1 %vm274_vm1, %v3161_v21  ;;  %3182 = vmatpush3.msra.mxu0 %v3615_v1  ;;  %v260_v28 = vpop.f32.mrf.mxu1  ;;  %v919_v1 = vld [vmem:[%s4423_s5 + $0xb8] sm:$0xff] }
  0xde   :  { %2756 = vmatmul.mubr.msk.f32.gmra.mxu0 %vm274_vm1, %v3175_v22  ;;  %464 = vmatprep.mubr.f32.mxu1 %v3512_v20 }
  0xdf   :  { %363 = vmatprep.mubr.f32.mxu0 %v3512_v20  ;;  %3183 = vmatprep.subr.mxu0 %v3624_v2 }
  0xe0   :  { %3184 = vmatpush3.msra.mxu0 %v3624_v2  ;;  %626 = vmatprep.subr.mxu1 %v2772_v35  ;;  %v903_v2 = vld [vmem:[%s4423_s5 + $0x38] sm:$0xff] }
  0xe1   :  { %2761 = vmatmul.mubr.msk.f32.gmra.mxu1 %vm274_vm1, %v154_v27  ;;  %3185 = vmatprep.subr.mxu0 %v3633_v3 }
  0xe2   :  { %2757 = vmatmul.mubr.msk.f32.gmra.mxu0 %vm274_vm1, %v260_v28  ;;  %470 = vmatprep.mubr.f32.mxu1 %v3512_v20 }
  0xe3   :  { %369 = vmatprep.mubr.f32.mxu0 %v3512_v20  ;;  %3186 = vmatpush3.msra.mxu0 %v3633_v3 }
  0xe4   :  { %627 = vmatpush1.msra.mxu1 %v2771_v36  ;;  %v702_v36 = vrot.slane %v693_v23, %v701_v24  ;;  %v901_v24 = vld [vmem:[%s4423_s5 + $0x28] sm:$0xff] }
  0xe5   :  { %2762 = vmatmul.mubr.msk.f32.gmra.mxu1 %vm274_vm1, %v3164_v25  ;;  %2933 = vmatprep.subr.mxu1 %v927_v49 }
  0xe6   :  { %2758 = vmatmul.mubr.msk.f32.gmra.mxu0 %vm274_vm1, %v3178_v26  ;;  %660 = vmatprep.mubr.f32.mxu1 %v3512_v20 }
  0xe7   :  { %3187 = vmatprep.mubr.msk.f32.mxu0 %vm65_vm0, %v2763_v29 }
  0xea   :  { %3188 = vmatmul.mubr.msk.f32.vlgmr.msra.gmra.mxu0 %vm65_vm0, %v2764_v30 }
  0xeb   :  { %3190 = vmatprep.mubr.msk.f32.mxu0 %vm65_vm0, %v2765_v31 }
  0xee   :  { %3191 = vmatmul.mubr.msk.f32.gmra.mxu0 %vm65_vm0, %v2766_v32  ;;  %v698_v32 = vrot.slane %v693_v23, %v697_v18  ;;  %v2807_v18 = vld [vmem:[%s4423_s5 + $0x1b0] sm:$0xff]  ;;  %v2806_v23 = vld [vmem:[%s4423_s5 + $0x1a8] sm:$0xff] }
  0xef   :  { %793 = vmatprep.mubr.f32.mxu0 %v3512_v20 }
 0x199   :  { %v454_v3 = vpop.f32.mrf.mxu1 }
 0x19a   :  { %v3753_v37 = vpop.f32.mrf.mxu0 }
 0x19b   :  { %v456_v4 = vpop.f32.mrf.mxu1 }
 0x19c   :  { %v3755_v38 = vpop.f32.mrf.mxu0 }
 0x19d   :  { %v460_v5 = vpop.f32.mrf.mxu1  ;;  %v457_v35 = vadd.f32 %v456_v4, %v3755_v38  ;;  %v2798_v4 = vld [vmem:[%s4423_s5 + $0x168] sm:$0xff] }
 0x19e   :  { %v3757_v39 = vpop.f32.mrf.mxu0 }
 0x19f   :  { %v462_v6 = vpop.f32.mrf.mxu1  ;;  %v461_v31 = vadd.f32 %v460_v5, %v3757_v39  ;;  %v2813_v5 = vld [vmem:[%s4423_s5 + $0x1e0] sm:$0xff] }
 0x1a0   :  { %v3759_v40 = vpop.f32.mrf.mxu0 }
 0x1a1   :  { %v466_v7 = vpop.f32.mrf.mxu1  ;;  %v463_v27 = vadd.f32 %v462_v6, %v3759_v40  ;;  %v2797_v6 = vld [vmem:[%s4423_s5 + $0x160] sm:$0xff] }
 0x1a2   :  { %v3761_v41 = vpop.f32.mrf.mxu0 }
 0x1a3   :  { %v468_v8 = vpop.f32.mrf.mxu1  ;;  %v467_v25 = vadd.f32 %v466_v7, %v3761_v41  ;;  %v2812_v7 = vld [vmem:[%s4423_s5 + $0x1d8] sm:$0xff] }
 0x1a4   :  { %v3763_v42 = vpop.f32.mrf.mxu0 }
 0x1a5   :  { %v472_v9 = vpop.f32.mrf.mxu1  ;;  %v469_v21 = vadd.f32 %v468_v8, %v3763_v42  ;;  %v2796_v8 = vld [vmem:[%s4423_s5 + $0x158] sm:$0xff] }
 0x1a6   :  { %v3765_v43 = vpop.f32.mrf.mxu0 }
 0x1a7   :  { %v474_v10 = vpop.f32.mrf.mxu1  ;;  %v473_v22 = vadd.f32 %v472_v9, %v3765_v43  ;;  %v2811_v9 = vld [vmem:[%s4423_s5 + $0x1d0] sm:$0xff] }
 0x1a8   :  { %v3767_v44 = vpop.f32.mrf.mxu0 }
 0x1a9   :  { %v475_v28 = vadd.f32 %v474_v10, %v3767_v44  ;;  %v2795_v10 = vld [vmem:[%s4423_s5 + $0x150] sm:$0xff] }
 0x1aa   :  { %v3189_v45 = vpop.f32.mrf.mxu0 }
 0x1ac   :  { %v560_v46 = vpop.f32.mrf.mxu0 }
 0x1ad   :  { %2775 = vmatmul.mubr.msk.f32.vlgmr.msra.gmra.mxu1 %vm274_vm1, %v560_v46 }
 0x1ae   :  { %666 = vmatprep.mubr.f32.mxu1 %v3512_v20  ;;  %v3192_v47 = vpop.f32.mrf.mxu0  ;;  %2934 = vmatpush3.msra.mxu1 %v911_v50 }
 0x1af   :  { %2935 = vmatprep.subr.mxu1 %v926_v51 }
 0x1b0   :  { %v570_v48 = vpop.f32.mrf.mxu0  ;;  %2936 = vmatpush3.msra.mxu1 %v910_v52 }
 0x1b1   :  { %2776 = vmatmul.mubr.msk.f32.gmra.mxu1 %vm274_vm1, %v3189_v45  ;;  %2937 = vmatprep.subr.mxu1 %v925_v53  ;;  %v455_v45 = vadd.f32 %v454_v3, %v3753_v37  ;;  %v2814_v3 = vld [vmem:[%s4423_s5 + $0x1e8] sm:$0xff] }
 0x1b2   :  { %672 = vmatprep.mubr.f32.mxu1 %v3512_v20  ;;  %2938 = vmatpush3.msra.mxu1 %v909_v54 }
 0x1b3   :  { %2939 = vmatprep.subr.mxu1 %v924_v55 }
 0x1b4   :  { %2940 = vmatpush3.msra.mxu1 %v908_v56 }
 0x1b5   :  { %2777 = vmatmul.mubr.msk.f32.gmra.mxu1 %vm274_vm1, %v570_v48  ;;  %2941 = vmatprep.subr.mxu1 %v923_v57 }
 0x1b6   :  { %678 = vmatprep.mubr.f32.mxu1 %v3512_v20  ;;  %2942 = vmatpush3.msra.mxu1 %v907_v58 }
 0x1b7   :  { %2943 = vmatprep.subr.mxu1 %v922_v59  ;;  %v721_v59 = vld [vmem:[%s4422_s4] sm:$0xff] }
 0x1b8   :  { %2944 = vmatpush3.msra.mxu1 %v906_v60  ;;  %v722_v60 = vld [vmem:[%s4422_s4 + $0x8] sm:$0xff] }
 0x1b9   :  { %2778 = vmatmul.mubr.msk.f32.gmra.mxu1 %vm274_vm1, %v3192_v47  ;;  %2945 = vmatprep.subr.mxu1 %v921_v61  ;;  %v2781_v61 = vld [vmem:[%s4422_s4 + $0x10] sm:$0xff] }
 0x1ba   :  { %2946 = vmatpush3.msra.mxu1 %v905_v62  ;;  %v2816_v62 = vld [vmem:[%s4423_s5 + $0x1f8] sm:$0xff] }
 0x1bb   :  { %2947 = vmatprep.subr.mxu1 %v920_v63  ;;  %v2800_v63 = vld [vmem:[%s4423_s5 + $0x178] sm:$0xff] }
 0x1bc   :  { %2948 = vmatpush3.msra.mxu1 %v904_v0  ;;  %v2815_v0 = vld [vmem:[%s4423_s5 + $0x1f0] sm:$0xff] }
 0x1bd   :  { %2949 = vmatprep.subr.mxu1 %v919_v1  ;;  %v2799_v1 = vld [vmem:[%s4423_s5 + $0x170] sm:$0xff] }
 0x1be   :  { %2950 = vmatpush3.msra.mxu1 %v903_v2  ;;  %v2782_v2 = vld [vmem:[%s4422_s4 + $0x18] sm:$0xff] }
 0x26d   :  { %v662_v11 = vpop.f32.mrf.mxu1 }
 0x26e   :  { %v685_v44 = vadd.f32 %v662_v11, %v455_v45  ;;  %v2810_v11 = vld [vmem:[%s4423_s5 + $0x1c8] sm:$0xff] }
 0x26f   :  { %v664_v13 = vpop.f32.mrf.mxu1  ;;  %v2802_v45 = vld [vmem:[%s4423_s5 + $0x188] sm:$0xff] }
 0x270   :  { %v686_v47 = vadd.f32 %v664_v13, %v457_v35  ;;  %v705_v38 = vadd.f32 %v698_v32, %v685_v44  ;;  %v2809_v13 = vld [vmem:[%s4423_s5 + $0x1c0] sm:$0xff]  ;;  %v2803_v35 = vld [vmem:[%s4423_s5 + $0x190] sm:$0xff] }
 0x271   :  { %v668_v14 = vpop.f32.mrf.mxu1  ;;  %v2785_v44 = vld [vmem:[%s4423_s5 + $0x100] sm:$0xff] }
 0x272   :  { %v687_v41 = vadd.f32 %v668_v14, %v461_v31  ;;  %v706_v53 = vadd.f32 %v702_v36, %v686_v47  ;;  %v713_v58 = vmax.f32 %v705_v38, 0.0  ;;  %v2793_v14 = vld [vmem:[%s4423_s5 + $0x140] sm:$0xff]  ;;  %v2804_v31 = vld [vmem:[%s4423_s5 + $0x198] sm:$0xff] }
 0x273   :  { %v670_v16 = vpop.f32.mrf.mxu1  ;;  %v912_v47 = vld [vmem:[%s4423_s5 + $0x80] sm:$0xff] }
 0x274   :  { %v688_v42 = vadd.f32 %v670_v16, %v463_v27  ;;  %v707_v39 = vadd.f32 %v698_v32, %v687_v41  ;;  %v714_v57 = vmax.f32 %v706_v53, 0.0  ;;  %v2792_v16 = vld [vmem:[%s4423_s5 + $0x138] sm:$0xff]  ;;  %v2805_v27 = vld [vmem:[%s4423_s5 + $0x1a0] sm:$0xff]  ;;  %v897_v41 = vld [vmem:[%s4423_s5 + $0x8] sm:$0xff] }
 0x275   :  { %v674_v17 = vpop.f32.mrf.mxu1 }
 0x276   :  { %v689_v33 = vadd.f32 %v674_v17, %v467_v25  ;;  %v708_v50 = vadd.f32 %v702_v36, %v688_v42  ;;  %v715_v37 = vmax.f32 %v707_v39, 0.0  ;;  %v918_v17 = vld [vmem:[%s4423_s5 + $0xb0] sm:$0xff]  ;;  %v2790_v25 = vld [vmem:[%s4423_s5 + $0x128] sm:$0xff] }
 0x277   :  { %v676_v19 = vpop.f32.mrf.mxu1  ;;  %2951 = vmatprep.subr.mxu1 %v918_v17  ;;  %v2787_v42 = vld [vmem:[%s4423_s5 + $0x110] sm:$0xff] }
 0x278   :  { %v690_v29 = vadd.f32 %v676_v19, %v469_v21  ;;  %v709_v49 = vadd.f32 %v698_v32, %v689_v33  ;;  %v716_v56 = vmax.f32 %v708_v50, 0.0  ;;  %v902_v19 = vld [vmem:[%s4423_s5 + $0x30] sm:$0xff]  ;;  %v2788_v33 = vld [vmem:[%s4423_s5 + $0x118] sm:$0xff] }
 0x279   :  { %v680_v26 = vpop.f32.mrf.mxu1  ;;  %v2791_v21 = vld [vmem:[%s4423_s5 + $0x130] sm:$0xff]  ;;  %2952 = vmatpush3.msra.mxu1 %v902_v19 }
 0x27a   :  { %v691_v30 = vadd.f32 %v680_v26, %v473_v22  ;;  %v710_v40 = vadd.f32 %v702_v36, %v690_v29  ;;  %v717_v55 = vmax.f32 %v709_v49, 0.0  ;;  %v917_v22 = vld [vmem:[%s4423_s5 + $0xa8] sm:$0xff]  ;;  %v916_v26 = vld [vmem:[%s4423_s5 + $0xa0] sm:$0xff] }
 0x27b   :  { %v682_v34 = vpop.f32.mrf.mxu1  ;;  %2953 = vmatprep.subr.mxu1 %v917_v22  ;;  %v2789_v29 = vld [vmem:[%s4423_s5 + $0x120] sm:$0xff] }
 0x27c   :  { %v692_v43 = vadd.f32 %v682_v34, %v475_v28  ;;  %v711_v46 = vadd.f32 %v698_v32, %v691_v30  ;;  %v718_v54 = vmax.f32 %v710_v40, 0.0  ;;  %2954 = vmatpush3.msra.mxu1 %v901_v24  ;;  %v900_v28 = vld [vmem:[%s4423_s5 + $0x20] sm:$0xff]  ;;  %v915_v30 = vld [vmem:[%s4423_s5 + $0x98] sm:$0xff]  ;;  %v914_v34 = vld [vmem:[%s4423_s5 + $0x90] sm:$0xff] }
 0x27d   :  { %2955 = vmatprep.subr.mxu1 %v916_v26  ;;  %v899_v32 = vld [vmem:[%s4423_s5 + $0x18] sm:$0xff]  ;;  %v2801_v40 = vld [vmem:[%s4423_s5 + $0x180] sm:$0xff]  ;;  %v1114_v24 = vld [vmem:[%s4424_s6 + $0x8] sm:$0xff] }
 0x27e   :  { %v712_v48 = vadd.f32 %v702_v36, %v692_v43  ;;  %v719_v52 = vmax.f32 %v711_v46, 0.0  ;;  %2956 = vmatpush3.msra.mxu1 %v900_v28  ;;  %v898_v36 = vld [vmem:[%s4423_s5 + $0x10] sm:$0xff]  ;;  %v913_v43 = vld [vmem:[%s4423_s5 + $0x88] sm:$0xff]  ;;  %v2820_v26 = vld [vmem:[%s4424_s6 + $0x18] sm:$0xff] }
 0x27f   :  { %2957 = vmatprep.subr.mxu1 %v915_v30  ;;  %v2786_v46 = vld [vmem:[%s4423_s5 + $0x108] sm:$0xff]  ;;  %v2837_v28 = vld [vmem:[%s4425_s7 + $0xf0] sm:$0xff]  ;;  %v2835_v30 = vld [vmem:[%s4425_s7 + $0xe0] sm:$0xff] }
 0x280   :  { %v720_v51 = vmax.f32 %v712_v48, 0.0  ;;  %2958 = vmatpush3.msra.mxu1 %v899_v32  ;;  %v896_v48 = vld [vmem:[%s4423_s5] sm:$0xff]  ;;  %v2833_v32 = vld [vmem:[%s4425_s7 + $0xd0] sm:$0xff] }
 0x281   :  { %2959 = vmatprep.subr.mxu1 %v914_v34  ;;  %v2831_v34 = vld [vmem:[%s4425_s7 + $0xc0] sm:$0xff] }
 0x282   :  { %753 = vmatprep.subr.mxu0 %v720_v51  ;;  %2960 = vmatpush3.msra.mxu1 %v898_v36  ;;  %v2829_v36 = vld [vmem:[%s4425_s7 + $0xb0] sm:$0xff] }
 0x283   :  { %754 = vmatpush1.msra.mxu0 %v719_v52  ;;  %2961 = vmatprep.subr.mxu1 %v913_v43  ;;  %v2827_v43 = vld [vmem:[%s4425_s7 + $0xa0] sm:$0xff] }
 0x284   :  { %755 = vmatprep.subr.mxu0 %v718_v54  ;;  %2962 = vmatpush3.msra.mxu1 %v897_v41  ;;  %v2825_v41 = vld [vmem:[%s4425_s7 + $0x90] sm:$0xff] }
 0x285   :  { %756 = vmatpush1.msra.mxu0 %v717_v55  ;;  %2963 = vmatprep.subr.mxu1 %v912_v47  ;;  %v2823_v47 = vld [vmem:[%s4425_s7 + $0x80] sm:$0xff] }
 0x286   :  { %757 = vmatprep.subr.mxu0 %v716_v56  ;;  %2964 = vmatpush3.msra.mxu1 %v896_v48  ;;  %v1196_v48 = vld [vmem:[%s4425_s7] sm:$0xff] }
 0x287   :  { %758 = vmatpush1.msra.mxu0 %v715_v37 }
 0x288   :  { %759 = vmatprep.subr.mxu0 %v714_v57 }
 0x289   :  { %760 = vmatpush1.msra.mxu0 %v713_v58 }
 0x28a   :  { %2779 = vmatmul.mubr.msk.f32.vlgmr.msra.gmra.mxu0 %vm65_vm0, %v721_v59  ;;  %839 = vmatprep.subr.mxu0 %v720_v51  ;;  %v1211_v59 = vld [vmem:[%s4425_s7 + $0x78] sm:$0xff] }
 0x28b   :  { %840 = vmatpush1.msra.mxu0 %v719_v52  ;;  %799 = vmatprep.mubr.f32.mxu0 %v3512_v20 }
 0x28c   :  { %841 = vmatprep.subr.mxu0 %v718_v54 }
 0x28d   :  { %842 = vmatpush1.msra.mxu0 %v717_v55 }
 0x28e   :  { %2780 = vmatmul.mubr.msk.f32.gmra.mxu0 %vm65_vm0, %v722_v60  ;;  %843 = vmatprep.subr.mxu0 %v716_v56  ;;  %v1210_v60 = vld [vmem:[%s4425_s7 + $0x70] sm:$0xff] }
 0x28f   :  { %844 = vmatpush1.msra.mxu0 %v715_v37  ;;  %879 = vmatprep.mubr.f32.mxu0 %v3512_v20 }
 0x290   :  { %845 = vmatprep.subr.mxu0 %v714_v57 }
 0x291   :  { %846 = vmatpush1.msra.mxu0 %v713_v58  ;;  %v1113_v58 = vld [vmem:[%s4424_s6] sm:$0xff] }
 0x292   :  { %2783 = vmatmul.mubr.msk.f32.vlgmr.msra.gmra.mxu0 %vm65_vm0, %v2781_v61  ;;  %2971 = vmatprep.subr.mxu0 %v2816_v62  ;;  %v1209_v61 = vld [vmem:[%s4425_s7 + $0x68] sm:$0xff]  ;;  %v1208_v62 = vld [vmem:[%s4425_s7 + $0x60] sm:$0xff] }
 0x293   :  { %885 = vmatprep.mubr.f32.mxu0 %v3512_v20  ;;  %2972 = vmatpush3.msra.mxu0 %v2800_v63  ;;  %v1207_v63 = vld [vmem:[%s4425_s7 + $0x58] sm:$0xff] }
 0x294   :  { %2973 = vmatprep.subr.mxu0 %v2815_v0  ;;  %v1206_v0 = vld [vmem:[%s4425_s7 + $0x50] sm:$0xff] }
 0x295   :  { %2974 = vmatpush3.msra.mxu0 %v2799_v1  ;;  %v1205_v1 = vld [vmem:[%s4425_s7 + $0x48] sm:$0xff] }
 0x296   :  { %2784 = vmatmul.mubr.msk.f32.gmra.mxu0 %vm65_vm0, %v2782_v2  ;;  %2975 = vmatprep.subr.mxu0 %v2814_v3  ;;  %v1204_v2 = vld [vmem:[%s4425_s7 + $0x40] sm:$0xff]  ;;  %v1203_v3 = vld [vmem:[%s4425_s7 + $0x38] sm:$0xff] }
 0x297   :  { %2976 = vmatpush3.msra.mxu0 %v2798_v4  ;;  %v1202_v4 = vld [vmem:[%s4425_s7 + $0x30] sm:$0xff] }
 0x298   :  { %2977 = vmatprep.subr.mxu0 %v2813_v5  ;;  %v1201_v5 = vld [vmem:[%s4425_s7 + $0x28] sm:$0xff] }
 0x299   :  { %2978 = vmatpush3.msra.mxu0 %v2797_v6  ;;  %v1200_v6 = vld [vmem:[%s4425_s7 + $0x20] sm:$0xff] }
 0x29a   :  { %2979 = vmatprep.subr.mxu0 %v2812_v7  ;;  %v1199_v7 = vld [vmem:[%s4425_s7 + $0x18] sm:$0xff] }
 0x29b   :  { %2980 = vmatpush3.msra.mxu0 %v2796_v8  ;;  %v1198_v8 = vld [vmem:[%s4425_s7 + $0x10] sm:$0xff] }
 0x29c   :  { %2981 = vmatprep.subr.mxu0 %v2811_v9 }
 0x29d   :  { %2982 = vmatpush3.msra.mxu0 %v2795_v10 }
 0x29e   :  { %2983 = vmatprep.subr.mxu0 %v2810_v11 }
 0x29f   :  { %2984 = vmatpush3.msra.mxu0 %v2794_v12 }
 0x2a0   :  { %2985 = vmatprep.subr.mxu0 %v2809_v13 }
 0x2a1   :  { %2986 = vmatpush3.msra.mxu0 %v2793_v14 }
 0x2a2   :  { %2987 = vmatprep.subr.mxu0 %v2808_v15 }
 0x2a3   :  { %2988 = vmatpush3.msra.mxu0 %v2792_v16 }
 0x2a4   :  { %2989 = vmatprep.subr.mxu0 %v2807_v18 }
 0x2a5   :  { %2990 = vmatpush3.msra.mxu0 %v2791_v21 }
 0x2a6   :  { %2991 = vmatprep.subr.mxu0 %v2806_v23 }
 0x2a7   :  { %2992 = vmatpush3.msra.mxu0 %v2790_v25  ;;  %v2819_v25 = vld [vmem:[%s4424_s6 + $0x10] sm:$0xff] }
 0x2a8   :  { %2993 = vmatprep.subr.mxu0 %v2805_v27  ;;  %v2838_v27 = vld [vmem:[%s4425_s7 + $0xf8] sm:$0xff] }
 0x2a9   :  { %2994 = vmatpush3.msra.mxu0 %v2789_v29  ;;  %v2836_v29 = vld [vmem:[%s4425_s7 + $0xe8] sm:$0xff] }
 0x2aa   :  { %2995 = vmatprep.subr.mxu0 %v2804_v31  ;;  %v2834_v31 = vld [vmem:[%s4425_s7 + $0xd8] sm:$0xff] }
 0x2ab   :  { %2996 = vmatpush3.msra.mxu0 %v2788_v33  ;;  %v2832_v33 = vld [vmem:[%s4425_s7 + $0xc8] sm:$0xff] }
 0x2ac   :  { %2997 = vmatprep.subr.mxu0 %v2803_v35  ;;  %v2830_v35 = vld [vmem:[%s4425_s7 + $0xb8] sm:$0xff] }
 0x2ad   :  { %2998 = vmatpush3.msra.mxu0 %v2787_v42  ;;  %v2828_v42 = vld [vmem:[%s4425_s7 + $0xa8] sm:$0xff] }
 0x2ae   :  { %2999 = vmatprep.subr.mxu0 %v2802_v45  ;;  %v2826_v45 = vld [vmem:[%s4425_s7 + $0x98] sm:$0xff] }
 0x2af   :  { %3000 = vmatpush3.msra.mxu0 %v2786_v46  ;;  %v2824_v46 = vld [vmem:[%s4425_s7 + $0x88] sm:$0xff] }
 0x2b0   :  { %3001 = vmatprep.subr.mxu0 %v2801_v40  ;;  %v1197_v40 = vld [vmem:[%s4425_s7 + $0x8] sm:$0xff] }
 0x2b1   :  { %3002 = vmatpush3.msra.mxu0 %v2785_v44  ;;  %v2858_v44 = vld [vmem:[%s4425_s7 + $0x178] sm:$0xff] }
 0x2b2   :  { %3242 = vmatprep.subr.mxu0 %v1211_v59 }
 0x34a   :  { %v795_v49 = vpop.f32.mrf.mxu0 }
 0x34c   :  { %v797_v50 = vpop.f32.mrf.mxu0 }
 0x34e   :  { %v801_v51 = vpop.f32.mrf.mxu0 }
 0x350   :  { %v803_v39 = vpop.f32.mrf.mxu0 }
 0x352   :  { %v881_v52 = vpop.f32.mrf.mxu0 }
 0x353   :  { %v892_v38 = vmax.f32 %v795_v49, %v881_v52  ;;  %v2856_v52 = vld [vmem:[%s4425_s7 + $0x168] sm:$0xff] }
 0x354   :  { %v883_v53 = vpop.f32.mrf.mxu0 }
 0x355   :  { %v893_v54 = vmax.f32 %v797_v50, %v883_v53 }
 0x356   :  { %v887_v55 = vpop.f32.mrf.mxu0 }
 0x357   :  { %992 = vmatprep.mubr.f32.mxu1 %v893_v54  ;;  %1100 = vmatprep.mubr.f32.mxu0 %v893_v54  ;;  %v894_v57 = vmax.f32 %v801_v51, %v887_v55  ;;  %v2857_v51 = vld [vmem:[%s4425_s7 + $0x170] sm:$0xff]  ;;  %v2839_v54 = vld [vmem:[%s4424_s6 + $0x20] sm:$0xff]  ;;  %v2840_v55 = vld [vmem:[%s4424_s6 + $0x28] sm:$0xff] }
 0x358   :  { %v889_v56 = vpop.f32.mrf.mxu0  ;;  %993 = vmatmul.mubr.f32.vlgmr.msra.gmra.mxu1 %v892_v38  ;;  %1101 = vmatmul.mubr.f32.vlgmr.msra.gmra.mxu0 %v892_v38  ;;  %v2855_v38 = vld [vmem:[%s4425_s7 + $0x160] sm:$0xff] }
 0x359   :  { %v895_v37 = vmax.f32 %v803_v39, %v889_v56  ;;  %3243 = vmatpush3.msra.mxu0 %v1211_v59  ;;  %v2854_v56 = vld [vmem:[%s4425_s7 + $0x158] sm:$0xff] }
 0x35a   :  { %3244 = vmatprep.subr.mxu0 %v1210_v60  ;;  %v2850_v59 = vld [vmem:[%s4425_s7 + $0x138] sm:$0xff] }
 0x35b   :  { %997 = vmatprep.mubr.f32.mxu1 %v895_v37  ;;  %1105 = vmatprep.mubr.f32.mxu0 %v895_v37  ;;  %v2853_v37 = vld [vmem:[%s4425_s7 + $0x150] sm:$0xff] }
 0x35c   :  { %998 = vmatmul.mubr.f32.gmra.mxu1 %v894_v57  ;;  %1106 = vmatmul.mubr.f32.gmra.mxu0 %v894_v57  ;;  %v2852_v57 = vld [vmem:[%s4425_s7 + $0x148] sm:$0xff] }
 0x35d   :  { %3197 = vmatprep.mubr.msk.f32.mxu1 %vm274_vm1, %v1113_v58  ;;  %3245 = vmatpush3.msra.mxu0 %v1210_v60  ;;  %v2851_v58 = vld [vmem:[%s4425_s7 + $0x140] sm:$0xff]  ;;  %v2849_v60 = vld [vmem:[%s4425_s7 + $0x130] sm:$0xff] }
 0x35e   :  { %3246 = vmatprep.subr.mxu0 %v1209_v61 }
 0x35f   :  { %3247 = vmatpush3.msra.mxu0 %v1209_v61  ;;  %v2848_v61 = vld [vmem:[%s4425_s7 + $0x128] sm:$0xff] }
 0x360   :  { %3248 = vmatprep.subr.mxu0 %v1208_v62 }
 0x361   :  { %3249 = vmatpush3.msra.mxu0 %v1208_v62  ;;  %v2847_v62 = vld [vmem:[%s4425_s7 + $0x120] sm:$0xff] }
 0x362   :  { %3250 = vmatprep.subr.mxu0 %v1207_v63 }
 0x363   :  { %3251 = vmatpush3.msra.mxu0 %v1207_v63  ;;  %v2846_v63 = vld [vmem:[%s4425_s7 + $0x118] sm:$0xff] }
 0x364   :  { %3252 = vmatprep.subr.mxu0 %v1206_v0 }
 0x365   :  { %3253 = vmatpush3.msra.mxu0 %v1206_v0  ;;  %v2845_v0 = vld [vmem:[%s4425_s7 + $0x110] sm:$0xff] }
 0x366   :  { %3254 = vmatprep.subr.mxu0 %v1205_v1 }
 0x367   :  { %3255 = vmatpush3.msra.mxu0 %v1205_v1  ;;  %v2844_v1 = vld [vmem:[%s4425_s7 + $0x108] sm:$0xff] }
 0x368   :  { %3256 = vmatprep.subr.mxu0 %v1204_v2 }
 0x369   :  { %3257 = vmatpush3.msra.mxu0 %v1204_v2  ;;  %v2843_v2 = vld [vmem:[%s4425_s7 + $0x100] sm:$0xff] }
 0x36a   :  { %3258 = vmatprep.subr.mxu0 %v1203_v3 }
 0x36b   :  { %3259 = vmatpush3.msra.mxu0 %v1203_v3 }
 0x36c   :  { %3260 = vmatprep.subr.mxu0 %v1202_v4 }
 0x36d   :  { %3261 = vmatpush3.msra.mxu0 %v1202_v4 }
 0x36e   :  { %3262 = vmatprep.subr.mxu0 %v1201_v5 }
 0x36f   :  { %3263 = vmatpush3.msra.mxu0 %v1201_v5 }
 0x370   :  { %3264 = vmatprep.subr.mxu0 %v1200_v6 }
 0x371   :  { %3265 = vmatpush3.msra.mxu0 %v1200_v6 }
 0x372   :  { %3266 = vmatprep.subr.mxu0 %v1199_v7 }
 0x373   :  { %3267 = vmatpush3.msra.mxu0 %v1199_v7 }
 0x374   :  { %3268 = vmatprep.subr.mxu0 %v1198_v8 }
 0x375   :  { %3269 = vmatpush3.msra.mxu0 %v1198_v8 }
 0x376   :  { %3270 = vmatprep.subr.mxu0 %v1197_v40 }
 0x377   :  { %3271 = vmatpush3.msra.mxu0 %v1197_v40 }
 0x378   :  { %3272 = vmatprep.subr.mxu0 %v1196_v48 }
 0x379   :  { %3273 = vmatpush3.msra.mxu0 %v1196_v48  ;;  %v2872_v48 = vld [vmem:[%s4430_s12 + $0x10] sm:$0xff] }
 0x37a   :  { %3284 = vmatprep.subr.mxu0 %v2858_v44 }
 0x418   :  { %v2965_v9 = vpop.f32.mrf.mxu1  ;;  %v3003_v10 = vpop.f32.mrf.mxu0 }
 0x41a   :  { %v2966_v11 = vpop.f32.mrf.mxu1  ;;  %v3004_v12 = vpop.f32.mrf.mxu0 }
 0x41b   :  { %v2967_v17 = vadd.f32 %v2966_v11, %v2965_v9  ;;  %v3005_v18 = vadd.f32 %v3004_v12, %v3003_v10  ;;  %v2859_v11 = vld [vmem:[%s4426_s8] ss:$0 sm:$0xff] }
 0x41c   :  { %v2968_v13 = vpop.f32.mrf.mxu1  ;;  %v3006_v14 = vpop.f32.mrf.mxu0 }
 0x41d   :  { %v4046_v23 = vmax.f32 %v2967_v17, %v3005_v18 }
 0x41e   :  { %v2969_v15 = vpop.f32.mrf.mxu1  ;;  %v3007_v16 = vpop.f32.mrf.mxu0 }
 0x41f   :  { %v2970_v19 = vadd.f32 %v2969_v15, %v2968_v13  ;;  %v3008_v21 = vadd.f32 %v3007_v16, %v3006_v14 }
 0x421   :  { %v4044_v22 = vmax.f32 %v2970_v19, %v3008_v21  ;;  %v1652_v21 = vld [vmem:[%s4427_s9] sm:$0xff] }
 0x423   :  { %3193 = vmatprep.subr.mxu1 %v4044_v22 }
 0x424   :  { %3194 = vmatpush3.msra.mxu1 %v4044_v22 }
 0x425   :  { %3195 = vmatprep.subr.mxu1 %v4046_v23 }
 0x426   :  { %3196 = vmatpush3.msra.mxu1 %v4046_v23 }
 0x427   :  { %3198 = vmatmul.mubr.msk.f32.vlgmr.msra.gmra.mxu1 %vm274_vm1, %v1114_v24  ;;  %3200 = vmatprep.subr.mxu1 %v4044_v22  ;;  %v1804_v24 = vld [vmem:[%s4428_s10 + $0x10] sm:$0xff] }
 0x428   :  { %3201 = vmatpush3.msra.mxu1 %v4044_v22  ;;  %3204 = vmatprep.mubr.msk.f32.mxu1 %vm274_vm1, %v2819_v25  ;;  %v1803_v25 = vld [vmem:[%s4428_s10 + $0x8] sm:$0xff] }
 0x429   :  { %3202 = vmatprep.subr.mxu1 %v4046_v23 }
 0x42a   :  { %3203 = vmatpush3.msra.mxu1 %v4046_v23 }
 0x42b   :  { %3205 = vmatmul.mubr.msk.f32.vlgmr.msra.gmra.mxu1 %vm274_vm1, %v2820_v26  ;;  %3207 = vmatprep.subr.mxu1 %v2838_v27  ;;  %v1802_v26 = vld [vmem:[%s4428_s10] sm:$0xff] }
 0x42c   :  { %3208 = vmatpush3.msra.mxu1 %v2838_v27 }
 0x42d   :  { %3209 = vmatprep.subr.mxu1 %v2837_v28 }
 0x42e   :  { %3210 = vmatpush3.msra.mxu1 %v2837_v28 }
 0x42f   :  { %3211 = vmatprep.subr.mxu1 %v2836_v29 }
 0x430   :  { %3212 = vmatpush3.msra.mxu1 %v2836_v29 }
 0x431   :  { %3213 = vmatprep.subr.mxu1 %v2835_v30 }
 0x432   :  { %3214 = vmatpush3.msra.mxu1 %v2835_v30 }
 0x433   :  { %3215 = vmatprep.subr.mxu1 %v2834_v31 }
 0x434   :  { %3216 = vmatpush3.msra.mxu1 %v2834_v31  ;;  %v2867_v31 = vld [vmem:[%s4428_s10 + $0x38] sm:$0xff] }
 0x435   :  { %3217 = vmatprep.subr.mxu1 %v2833_v32 }
 0x436   :  { %3218 = vmatpush3.msra.mxu1 %v2833_v32 }
 0x437   :  { %3219 = vmatprep.subr.mxu1 %v2832_v33 }
 0x438   :  { %3220 = vmatpush3.msra.mxu1 %v2832_v33  ;;  %v2866_v33 = vld [vmem:[%s4428_s10 + $0x30] sm:$0xff] }
 0x439   :  { %3221 = vmatprep.subr.mxu1 %v2831_v34 }
 0x43a   :  { %3222 = vmatpush3.msra.mxu1 %v2831_v34  ;;  %v2865_v34 = vld [vmem:[%s4428_s10 + $0x28] sm:$0xff] }
 0x43b   :  { %3223 = vmatprep.subr.mxu1 %v2830_v35 }
 0x43c   :  { %3224 = vmatpush3.msra.mxu1 %v2830_v35  ;;  %v2864_v35 = vld [vmem:[%s4428_s10 + $0x20] sm:$0xff] }
 0x43d   :  { %3225 = vmatprep.subr.mxu1 %v2829_v36 }
 0x43e   :  { %3226 = vmatpush3.msra.mxu1 %v2829_v36  ;;  %v1958_v36 = vld [vmem:[%s4430_s12 + $0x8] sm:$0xff] }
 0x43f   :  { %3227 = vmatprep.subr.mxu1 %v2828_v42 }
 0x440   :  { %3228 = vmatpush3.msra.mxu1 %v2828_v42  ;;  %v1957_v42 = vld [vmem:[%s4430_s12] sm:$0xff] }
 0x441   :  { %3229 = vmatprep.subr.mxu1 %v2827_v43 }
 0x442   :  { %3230 = vmatpush3.msra.mxu1 %v2827_v43 }
 0x443   :  { %3231 = vmatprep.subr.mxu1 %v2826_v45 }
 0x444   :  { %3232 = vmatpush3.msra.mxu1 %v2826_v45 }
 0x445   :  { %3233 = vmatprep.subr.mxu1 %v2825_v41 }
 0x446   :  { %3234 = vmatpush3.msra.mxu1 %v2825_v41 }
 0x447   :  { %3235 = vmatprep.subr.mxu1 %v2824_v46 }
 0x448   :  { %3236 = vmatpush3.msra.mxu1 %v2824_v46 }
 0x449   :  { %3237 = vmatprep.subr.mxu1 %v2823_v47 }
 0x44a   :  { %3238 = vmatpush3.msra.mxu1 %v2823_v47  ;;  %v2873_v47 = vld [vmem:[%s4430_s12 + $0x18] sm:$0xff] }
 0x44b   :  { %3277 = vmatprep.subr.mxu1 %v4044_v22 }
 0x4e7   :  { %v3199_v49 = vpop.f32.mrf.mxu1 }
 0x4e9   :  { %v1187_v50 = vpop.f32.mrf.mxu1 }
 0x4ea   :  { %3274 = vmatprep.mubr.f32.mxu0 %v1187_v50 }
 0x4eb   :  { %v3206_v39 = vpop.f32.mrf.mxu1  ;;  %3275 = vmatmul.mubr.f32.vlgmr.msra.gmra.mxu0 %v3199_v49  ;;  %v2870_v49 = vld [vmem:[%s4429_s11 + $0x10] sm:$0xff] }
 0x4ec   :  { %3285 = vmatpush3.msra.mxu0 %v2858_v44  ;;  %v1955_v44 = vld [vmem:[%s4429_s11] sm:$0xff] }
 0x4ed   :  { %v1287_v53 = vpop.f32.mrf.mxu1  ;;  %3286 = vmatprep.subr.mxu0 %v2857_v51 }
 0x4ee   :  { %3239 = vmatprep.mubr.f32.mxu1 %v1287_v53  ;;  %3287 = vmatpush3.msra.mxu0 %v2857_v51  ;;  %v2899_v51 = vld [vmem:[%s4433_s15 + $0xf8] sm:$0xff] }
 0x4ef   :  { %3240 = vmatmul.mubr.f32.vlgmr.msra.gmra.mxu1 %v3206_v39  ;;  %3288 = vmatprep.subr.mxu0 %v2856_v52 }
 0x4f0   :  { %3278 = vmatpush3.msra.mxu1 %v4044_v22  ;;  %3281 = vmatprep.mubr.msk.f32.mxu1 %vm274_vm1, %v2839_v54  ;;  %v2861_v22 = vld [vmem:[%s4427_s9 + $0x8] sm:$0xff]  ;;  %v2871_v54 = vld [vmem:[%s4429_s11 + $0x18] sm:$0xff] }
 0x4f1   :  { %3279 = vmatprep.subr.mxu1 %v4046_v23  ;;  %3289 = vmatpush3.msra.mxu0 %v2856_v52  ;;  %v2898_v52 = vld [vmem:[%s4433_s15 + $0xf0] sm:$0xff] }
 0x4f2   :  { %3280 = vmatpush3.msra.mxu1 %v4046_v23  ;;  %3290 = vmatprep.subr.mxu0 %v2855_v38  ;;  %v1805_v23 = vld [vmem:[%s4428_s10 + $0x18] sm:$0xff] }
 0x4f3   :  { %3282 = vmatmul.mubr.msk.f32.vlgmr.msra.gmra.mxu1 %vm274_vm1, %v2840_v55  ;;  %3291 = vmatpush3.msra.mxu0 %v2855_v38  ;;  %v2301_v38 = vld [vmem:[%s4433_s15 + $0x78] sm:$0xff]  ;;  %v2897_v55 = vld [vmem:[%s4433_s15 + $0xe8] sm:$0xff] }
 0x4f4   :  { %3292 = vmatprep.subr.mxu0 %v2854_v56  ;;  %3319 = vmatprep.subr.mxu1 %v3512_v20 }
 0x4f5   :  { %3293 = vmatpush3.msra.mxu0 %v2854_v56  ;;  %3323 = vmatprep.mubr.msk.f32.mxu1 %vm3513_vm2, %v3512_v20 }
 0x4f6   :  { %3294 = vmatprep.subr.mxu0 %v2853_v37 }
 0x4f7   :  { %3295 = vmatpush3.msra.mxu0 %v2853_v37  ;;  %v2300_v37 = vld [vmem:[%s4433_s15 + $0x70] sm:$0xff] }
 0x4f8   :  { %3296 = vmatprep.subr.mxu0 %v2852_v57 }
 0x4f9   :  { %3297 = vmatpush3.msra.mxu0 %v2852_v57  ;;  %v2896_v57 = vld [vmem:[%s4433_s15 + $0xe0] sm:$0xff] }
 0x4fa   :  { %3298 = vmatprep.subr.mxu0 %v2851_v58 }
 0x4fb   :  { %3299 = vmatpush3.msra.mxu0 %v2851_v58  ;;  %v2299_v58 = vld [vmem:[%s4433_s15 + $0x68] sm:$0xff] }
 0x4fc   :  { %3300 = vmatprep.subr.mxu0 %v2850_v59 }
 0x4fd   :  { %3301 = vmatpush3.msra.mxu0 %v2850_v59  ;;  %v2895_v59 = vld [vmem:[%s4433_s15 + $0xd8] sm:$0xff] }
 0x4fe   :  { %3302 = vmatprep.subr.mxu0 %v2849_v60 }
 0x4ff   :  { %3303 = vmatpush3.msra.mxu0 %v2849_v60  ;;  %v2298_v60 = vld [vmem:[%s4433_s15 + $0x60] sm:$0xff] }
 0x500   :  { %3304 = vmatprep.subr.mxu0 %v2848_v61 }
 0x501   :  { %3305 = vmatpush3.msra.mxu0 %v2848_v61  ;;  %v2894_v61 = vld [vmem:[%s4433_s15 + $0xd0] sm:$0xff] }
 0x502   :  { %3306 = vmatprep.subr.mxu0 %v2847_v62 }
 0x503   :  { %3307 = vmatpush3.msra.mxu0 %v2847_v62  ;;  %v2297_v62 = vld [vmem:[%s4433_s15 + $0x58] sm:$0xff] }
 0x504   :  { %3308 = vmatprep.subr.mxu0 %v2846_v63 }
 0x505   :  { %3309 = vmatpush3.msra.mxu0 %v2846_v63  ;;  %v2893_v63 = vld [vmem:[%s4433_s15 + $0xc8] sm:$0xff] }
 0x506   :  { %3310 = vmatprep.subr.mxu0 %v2845_v0 }
 0x507   :  { %3311 = vmatpush3.msra.mxu0 %v2845_v0  ;;  %v2296_v0 = vld [vmem:[%s4433_s15 + $0x50] sm:$0xff] }
 0x508   :  { %3312 = vmatprep.subr.mxu0 %v2844_v1 }
 0x509   :  { %3313 = vmatpush3.msra.mxu0 %v2844_v1  ;;  %v2892_v1 = vld [vmem:[%s4433_s15 + $0xc0] sm:$0xff] }
 0x50a   :  { %3314 = vmatprep.subr.mxu0 %v2843_v2 }
 0x50b   :  { %3315 = vmatpush3.msra.mxu0 %v2843_v2  ;;  %v2295_v2 = vld [vmem:[%s4433_s15 + $0x48] sm:$0xff] }
 0x5ab   :  { %v3276_v7 = vpop.f32.mrf.mxu0 }
 0x5ad   :  { %v1454_v8 = vpop.f32.mrf.mxu0 }
 0x5af   :  { %v3241_v3 = vpop.f32.mrf.mxu1 }
 0x5b0   :  { %v1460_v9 = vadd.f32 %v3276_v7, %v3241_v3  ;;  %v2891_v3 = vld [vmem:[%s4433_s15 + $0xb8] sm:$0xff]  ;;  %v2889_v7 = vld [vmem:[%s4433_s15 + $0xa8] sm:$0xff] }
 0x5b1   :  { %v1379_v4 = vpop.f32.mrf.mxu1 }
 0x5b2   :  { %v1455_v12 = vadd.f32 %v1454_v8, %v1379_v4  ;;  %v2294_v4 = vld [vmem:[%s4433_s15 + $0x40] sm:$0xff]  ;;  %v2292_v8 = vld [vmem:[%s4433_s15 + $0x30] sm:$0xff] }
 0x5b3   :  { %v3283_v5 = vpop.f32.mrf.mxu1 }
 0x5b5   :  { %v1538_v6 = vpop.f32.mrf.mxu1 }
 0x5b6   :  { %3316 = vmatprep.mubr.f32.mxu0 %v1538_v6  ;;  %v2293_v6 = vld [vmem:[%s4433_s15 + $0x38] sm:$0xff] }
 0x5b7   :  { %3317 = vmatmul.mubr.f32.vlgmr.msra.gmra.mxu0 %v3283_v5  ;;  %v2890_v5 = vld [vmem:[%s4433_s15 + $0xb0] sm:$0xff] }
 0x5b8   :  { %3371 = vmatprep.mubr.msk.f32.mxu0 %vm2108_vm3, %v2870_v49  ;;  %v2908_v49 = vld [vmem:[%s4434_s16] ss:$0 sm:$0xff] }
 0x677   :  { %v3318_v10 = vpop.f32.mrf.mxu0 }
 0x678   :  { %v1640_v13 = vadd.f32 %v3318_v10, %v1460_v9  ;;  %v2291_v9 = vld [vmem:[%s4433_s15 + $0x28] sm:$0xff]  ;;  %v2290_v10 = vld [vmem:[%s4433_s15 + $0x20] sm:$0xff] }
 0x679   :  { %v1630_v14 = vpop.f32.mrf.mxu0 }
 0x67a   :  { %v1649_v15 = vadd.f32 %v2859_v11, %v1640_v13  ;;  %v1639_v16 = vadd.f32 %v1630_v14, %v1455_v12  ;;  %v2289_v12 = vld [vmem:[%s4433_s15 + $0x18] sm:$0xff]  ;;  %v2288_v14 = vld [vmem:[%s4433_s15 + $0x10] sm:$0xff] }
 0x67b   :  { %v2887_v13 = vld [vmem:[%s4433_s15 + $0x98] sm:$0xff] }
 0x67c   :  { %v1651_v17 = vmax.f32 %v1649_v15, 0.0  ;;  %v1648_v18 = vadd.f32 %v2859_v11, %v1639_v16  ;;  %v2888_v11 = vld [vmem:[%s4433_s15 + $0xa0] sm:$0xff]  ;;  %v2886_v15 = vld [vmem:[%s4433_s15 + $0x90] sm:$0xff]  ;;  %v2287_v16 = vld [vmem:[%s4433_s15 + $0x8] sm:$0xff] }
 0x67e   :  { %v1650_v19 = vmax.f32 %v1648_v18, 0.0  ;;  %3320 = vmatpush3.msra.mxu1 %v1651_v17  ;;  %v2286_v18 = vld [vmem:[%s4433_s15] sm:$0xff] }
 0x67f   :  { %3321 = vmatprep.subr.mxu1 %v3512_v20 }
 0x680   :  { %3322 = vmatpush3.msra.mxu1 %v1650_v19 }
 0x681   :  { %3324 = vmatmul.mubr.msk.f32.vlgmr.msra.gmra.mxu1 %vm274_vm1, %v1652_v21  ;;  %3326 = vmatprep.subr.mxu1 %v3512_v20 }
 0x682   :  { %3327 = vmatpush3.msra.mxu1 %v1651_v17  ;;  %3330 = vmatprep.mubr.msk.f32.mxu1 %vm3513_vm2, %v3512_v20  ;;  %v2885_v17 = vld [vmem:[%s4433_s15 + $0x88] sm:$0xff] }
 0x683   :  { %3328 = vmatprep.subr.mxu1 %v3512_v20 }
 0x684   :  { %3329 = vmatpush3.msra.mxu1 %v1650_v19  ;;  %v2884_v19 = vld [vmem:[%s4433_s15 + $0x80] sm:$0xff] }
 0x685   :  { %3331 = vmatmul.mubr.msk.f32.vlgmr.msra.gmra.mxu1 %vm274_vm1, %v2861_v22  ;;  %3333 = vmatprep.subr.mxu1 %v3512_v20 }
 0x686   :  { %3334 = vmatpush3.msra.mxu1 %v1805_v23  ;;  %3341 = vmatprep.mubr.msk.f32.mxu1 %vm3513_vm2, %v3512_v20 }
 0x687   :  { %3335 = vmatprep.subr.mxu1 %v3512_v20 }
 0x688   :  { %3336 = vmatpush3.msra.mxu1 %v1804_v24  ;;  %v2879_v24 = vld [vmem:[%s4431_s13] ss:$0 sm:$0xff] }
 0x689   :  { %3337 = vmatprep.subr.mxu1 %v3512_v20 }
 0x68a   :  { %3338 = vmatpush3.msra.mxu1 %v1803_v25 }
 0x68b   :  { %3339 = vmatprep.subr.mxu1 %v3512_v20 }
 0x68c   :  { %3340 = vmatpush3.msra.mxu1 %v1802_v26 }
 0x68d   :  { %3344 = vmatprep.subr.mxu1 %v3512_v20 }
 0x741   :  { %v1722_v27 = vpop.f32.mrf.mxu1 }
 0x743   :  { %v3325_v28 = vpop.f32.mrf.mxu1 }
 0x745   :  { %v1797_v29 = vpop.f32.mrf.mxu1 }
 0x746   :  { %v1801_v30 = vmax.f32 %v1722_v27, %v1797_v29 }
 0x747   :  { %v3332_v32 = vpop.f32.mrf.mxu1 }
 0x748   :  { %3342 = vmatmul.mubr.msk.f32.vlgmr.msra.gmra.mxu1 %vm65_vm0, %v1801_v30  ;;  %v2880_v32 = vld [vmem:[%s4432_s14 + $0x20] sm:$0xff] }
 0x749   :  { %3345 = vmatpush3.msra.mxu1 %v2867_v31  ;;  %3352 = vmatprep.mubr.msk.f32.mxu1 %vm3513_vm2, %v3512_v20 }
 0x74a   :  { %3346 = vmatprep.subr.mxu1 %v3512_v20 }
 0x74b   :  { %3347 = vmatpush3.msra.mxu1 %v2866_v33  ;;  %v2282_v33 = vld [vmem:[%s4432_s14] sm:$0xff] }
 0x74c   :  { %3348 = vmatprep.subr.mxu1 %v3512_v20 }
 0x74d   :  { %3349 = vmatpush3.msra.mxu1 %v2865_v34 }
 0x74e   :  { %3350 = vmatprep.subr.mxu1 %v3512_v20 }
 0x74f   :  { %3351 = vmatpush3.msra.mxu1 %v2864_v35 }
 0x750   :  { %3353 = vmatmul.mubr.msk.f32.vlgmr.msra.gmra.mxu1 %vm65_vm0, %v1801_v30  ;;  %3355 = vmatprep.subr.mxu1 %v3512_v20 }
 0x751   :  { %3359 = vmatprep.mubr.msk.f32.mxu1 %vm3513_vm2, %v3512_v20  ;;  %3356 = vmatpush3.msra.mxu1 %v1958_v36 }
 0x752   :  { %3357 = vmatprep.subr.mxu1 %v3512_v20 }
 0x753   :  { %3358 = vmatpush3.msra.mxu1 %v1957_v42 }
 0x754   :  { %3362 = vmatprep.subr.mxu1 %v3512_v20 }
 0x808   :  { %v1875_v43 = vpop.f32.mrf.mxu1 }
 0x80a   :  { %v3343_v45 = vpop.f32.mrf.mxu1 }
 0x80b   :  { %v2283_v45 = vld [vmem:[%s4432_s14 + $0x8] sm:$0xff] }
 0x810   :  { %v1950_v41 = vpop.f32.mrf.mxu1 }
 0x811   :  { %v1954_v46 = vmax.f32 %v1875_v43, %v1950_v41  ;;  %v2881_v43 = vld [vmem:[%s4432_s14 + $0x28] sm:$0xff]  ;;  %v2882_v41 = vld [vmem:[%s4432_s14 + $0x30] sm:$0xff] }
 0x812   :  { %v3354_v40 = vpop.f32.mrf.mxu1 }
 0x813   :  { %3360 = vmatmul.mubr.msk.f32.vlgmr.msra.gmra.mxu1 %vm274_vm1, %v1954_v46  ;;  %v2285_v40 = vld [vmem:[%s4432_s14 + $0x18] sm:$0xff] }
 0x814   :  { %3363 = vmatpush3.msra.mxu1 %v2873_v47  ;;  %3366 = vmatprep.mubr.msk.f32.mxu1 %vm3513_vm2, %v3512_v20  ;;  %v2883_v47 = vld [vmem:[%s4432_s14 + $0x38] sm:$0xff] }
 0x815   :  { %3364 = vmatprep.subr.mxu1 %v3512_v20  ;;  %v1956_v20 = vld [vmem:[%s4429_s11 + $0x8] sm:$0xff] }
 0x816   :  { %3365 = vmatpush3.msra.mxu1 %v2872_v48 }
 0x817   :  { %3367 = vmatmul.mubr.msk.f32.vlgmr.msra.gmra.mxu1 %vm274_vm1, %v1954_v46  ;;  %v2284_v46 = vld [vmem:[%s4432_s14 + $0x10] sm:$0xff]  ;;  %s3514_s14 = smov [#allocation2]  }
 0x818   :  { %3376 = vmatprep.mubr.msk.f32.mxu1 %vm2108_vm3, %v1955_v44  ;;  %s2728_s16 = sshll.u32 %s3514_s14, 4  ;;  %s2729_s16 = int_to_ptr.vmem [resolvable:$true] %s2728_s16 }
 0x819   :  { %s3490_s27 = scalar_lea.vmem %s2729_s16, 512  ;;  %p3495_p1 = scmp.lt.s32.totalorder %s2729_s16, %s2729_s16 }
 0x81a   :  { %p3491_p0 = scmp.ne.s32.totalorder %s2729_s16, %s3490_s27  ;;  %p3496_p2 = scmp.lt.s32.totalorder %s3490_s27, %s3490_s27 }
 0x81c   :  { %p3497_p3 = por %p3496_p2, %p3495_p1 }
 0x81e   :  { %p3498_p4 = pnand %p3497_p3, %p3491_p0 }
 0x8d3   :  { %v2028_v50 = vpop.f32.mrf.mxu1 }
 0x8d4   :  { %3374 = vmatprep.subr.mxu1 %v2028_v50 }
 0x8d5   :  { %v3361_v39 = vpop.f32.mrf.mxu1  ;;  %3375 = vmatpush3.msra.mxu1 %v2028_v50 }
 0x8d6   :  { %3377 = vmatmul.mubr.msk.f32.vlgmr.msra.gmra.mxu1 %vm2108_vm3, %v1956_v20  ;;  %3414 = vmatprep.subr.mxu1 %v2899_v51 }
 0x8d7   :  { %v2104_v53 = vpop.f32.mrf.mxu1  ;;  %3415 = vmatpush3.msra.mxu1 %v2899_v51 }
 0x8d8   :  { %3369 = vmatprep.subr.mxu0 %v2104_v53  ;;  %3416 = vmatprep.subr.mxu1 %v2898_v52 }
 0x8d9   :  { %v3368_v56 = vpop.f32.mrf.mxu1  ;;  %3370 = vmatpush3.msra.mxu0 %v2104_v53  ;;  %3417 = vmatpush3.msra.mxu1 %v2898_v52 }
 0x8da   :  { %3372 = vmatmul.mubr.msk.f32.vlgmr.msra.gmra.mxu0 %vm2108_vm3, %v2871_v54  ;;  %3379 = vmatprep.subr.mxu0 %v2301_v38 }
 0x8db   :  { %3380 = vmatpush3.msra.mxu0 %v2301_v38  ;;  %3418 = vmatprep.subr.mxu1 %v2897_v55 }
 0x8dc   :  { %3381 = vmatprep.subr.mxu0 %v2300_v37  ;;  %3419 = vmatpush3.msra.mxu1 %v2897_v55 }
 0x8dd   :  { %3382 = vmatpush3.msra.mxu0 %v2300_v37  ;;  %3420 = vmatprep.subr.mxu1 %v2896_v57 }
 0x8de   :  { %3383 = vmatprep.subr.mxu0 %v2299_v58  ;;  %3421 = vmatpush3.msra.mxu1 %v2896_v57 }
 0x8df   :  { %3384 = vmatpush3.msra.mxu0 %v2299_v58  ;;  %3422 = vmatprep.subr.mxu1 %v2895_v59 }
 0x8e0   :  { %3385 = vmatprep.subr.mxu0 %v2298_v60  ;;  %3423 = vmatpush3.msra.mxu1 %v2895_v59 }
 0x8e1   :  { %3386 = vmatpush3.msra.mxu0 %v2298_v60  ;;  %3424 = vmatprep.subr.mxu1 %v2894_v61 }
 0x8e2   :  { %3387 = vmatprep.subr.mxu0 %v2297_v62  ;;  %3425 = vmatpush3.msra.mxu1 %v2894_v61 }
 0x8e3   :  { %3388 = vmatpush3.msra.mxu0 %v2297_v62  ;;  %3426 = vmatprep.subr.mxu1 %v2893_v63 }
 0x8e4   :  { %3389 = vmatprep.subr.mxu0 %v2296_v0  ;;  %3427 = vmatpush3.msra.mxu1 %v2893_v63 }
 0x8e5   :  { %3390 = vmatpush3.msra.mxu0 %v2296_v0  ;;  %3428 = vmatprep.subr.mxu1 %v2892_v1 }
 0x8e6   :  { %3391 = vmatprep.subr.mxu0 %v2295_v2  ;;  %3429 = vmatpush3.msra.mxu1 %v2892_v1 }
 0x8e7   :  { %3392 = vmatpush3.msra.mxu0 %v2295_v2  ;;  %3430 = vmatprep.subr.mxu1 %v2891_v3 }
 0x8e8   :  { %3393 = vmatprep.subr.mxu0 %v2294_v4  ;;  %3431 = vmatpush3.msra.mxu1 %v2891_v3 }
 0x8e9   :  { %3394 = vmatpush3.msra.mxu0 %v2294_v4  ;;  %3432 = vmatprep.subr.mxu1 %v2890_v5 }
 0x8ea   :  { %3395 = vmatprep.subr.mxu0 %v2293_v6  ;;  %3433 = vmatpush3.msra.mxu1 %v2890_v5 }
 0x8eb   :  { %3396 = vmatpush3.msra.mxu0 %v2293_v6  ;;  %3434 = vmatprep.subr.mxu1 %v2889_v7 }
 0x8ec   :  { %3397 = vmatprep.subr.mxu0 %v2292_v8  ;;  %3435 = vmatpush3.msra.mxu1 %v2889_v7 }
 0x8ed   :  { %3398 = vmatpush3.msra.mxu0 %v2292_v8  ;;  %3436 = vmatprep.subr.mxu1 %v2888_v11 }
 0x8ee   :  { %3399 = vmatprep.subr.mxu0 %v2291_v9  ;;  %3437 = vmatpush3.msra.mxu1 %v2888_v11 }
 0x8ef   :  { %3400 = vmatpush3.msra.mxu0 %v2291_v9  ;;  %3438 = vmatprep.subr.mxu1 %v2887_v13 }
 0x8f0   :  { %3401 = vmatprep.subr.mxu0 %v2290_v10  ;;  %3439 = vmatpush3.msra.mxu1 %v2887_v13 }
 0x8f1   :  { %3402 = vmatpush3.msra.mxu0 %v2290_v10  ;;  %3440 = vmatprep.subr.mxu1 %v2886_v15 }
 0x8f2   :  { %3403 = vmatprep.subr.mxu0 %v2289_v12  ;;  %3441 = vmatpush3.msra.mxu1 %v2886_v15 }
 0x8f3   :  { %3404 = vmatpush3.msra.mxu0 %v2289_v12  ;;  %3442 = vmatprep.subr.mxu1 %v2885_v17 }
 0x8f4   :  { %3405 = vmatprep.subr.mxu0 %v2288_v14  ;;  %3443 = vmatpush3.msra.mxu1 %v2885_v17 }
 0x8f5   :  { %3406 = vmatpush3.msra.mxu0 %v2288_v14  ;;  %3444 = vmatprep.subr.mxu1 %v2884_v19 }
 0x8f6   :  { %3407 = vmatprep.subr.mxu0 %v2287_v16  ;;  %3445 = vmatpush3.msra.mxu1 %v2884_v19 }
 0x8f7   :  { %3408 = vmatpush3.msra.mxu0 %v2287_v16 }
 0x8f8   :  { %3409 = vmatprep.subr.mxu0 %v2286_v18 }
 0x8f9   :  { %3410 = vmatpush3.msra.mxu0 %v2286_v18 }
 0x996   :  { %v3378_v21 = vpop.f32.mrf.mxu1 }
 0x998   :  { %v2262_v26 = vpop.f32.mrf.mxu1 }
 0x99a   :  { %v3373_v22 = vpop.f32.mrf.mxu0 }
 0x99b   :  { %v2268_v23 = vadd.f32 %v3378_v21, %v3373_v22 }
 0x99c   :  { %v2181_v25 = vpop.f32.mrf.mxu0 }
 0x99d   :  { %v2263_v27 = vadd.f32 %v2262_v26, %v2181_v25  ;;  %v2279_v28 = vadd.f32 %v2879_v24, %v2268_v23 }
 0x99f   :  { %v2278_v29 = vadd.f32 %v2879_v24, %v2263_v27  ;;  %v2281_v31 = vmax.f32 %v2279_v28, 0.0 }
 0x9a1   :  { %v2280_v30 = vmax.f32 %v2278_v29, 0.0 }
 0x9a3   :  { %3411 = vmatprep.mubr.f32.mxu0 %v2280_v30  ;;  %3446 = vmatprep.mubr.f32.mxu1 %v2280_v30 }
 0x9a4   :  { %3412 = vmatmul.mubr.f32.vlgmr.msra.gmra.mxu0 %v2281_v31  ;;  %3447 = vmatmul.mubr.f32.vlgmr.msra.gmra.mxu1 %v2281_v31 }
 0x9a5   :  { %3453 = vmatprep.mubr.msk.f32.mxu0 %vm274_vm1, %v2880_v32  ;;  %3463 = vmatprep.mubr.msk.f32.mxu1 %vm274_vm1, %v2282_v33 }
 0xa64   :  { %v3413_v34 = vpop.f32.mrf.mxu0  ;;  %v3448_v35 = vpop.f32.mrf.mxu1 }
 0xa65   :  { %3449 = vmatprep.subr.mxu0 %v3448_v35  ;;  %3459 = vmatprep.subr.mxu1 %v3413_v34 }
 0xa66   :  { %v2368_v36 = vpop.f32.mrf.mxu0  ;;  %v2465_v42 = vpop.f32.mrf.mxu1  ;;  %3450 = vmatpush3.msra.mxu0 %v3448_v35  ;;  %3460 = vmatpush3.msra.mxu1 %v3413_v34 }
 0xa67   :  { %3451 = vmatprep.subr.mxu0 %v2465_v42  ;;  %3461 = vmatprep.subr.mxu1 %v2368_v36 }
 0xa68   :  { %3452 = vmatpush3.msra.mxu0 %v2465_v42  ;;  %3462 = vmatpush3.msra.mxu1 %v2368_v36 }
 0xa69   :  { %3454 = vmatmul.mubr.msk.f32.vlgmr.msra.gmra.mxu0 %vm274_vm1, %v2881_v43  ;;  %3464 = vmatmul.mubr.msk.f32.vlgmr.msra.gmra.mxu1 %vm274_vm1, %v2283_v45 }
 0xa6a   :  { %3456 = vmatprep.mubr.msk.f32.mxu0 %vm274_vm1, %v2882_v41  ;;  %3466 = vmatprep.mubr.msk.f32.mxu1 %vm274_vm1, %v2284_v46 }
 0xa6d   :  { %3457 = vmatmul.mubr.msk.f32.gmra.mxu0 %vm274_vm1, %v2883_v47  ;;  %3467 = vmatmul.mubr.msk.f32.gmra.mxu1 %vm274_vm1, %v2285_v40 }
 0xb29   :  { %v3455_v48 = vpop.f32.mrf.mxu0  ;;  %v3465_v44 = vpop.f32.mrf.mxu1 }
 0xb2a   :  { %v2655_v50 = vadd.f32 %v3465_v44, %v3455_v48 }
 0xb2b   :  { %v2552_v20 = vpop.f32.mrf.mxu0  ;;  %v2649_v51 = vpop.f32.mrf.mxu1 }
 0xb2c   :  { %v2676_v39 = vadd.f32 %v2908_v49, %v2655_v50  ;;  %v2650_v52 = vadd.f32 %v2649_v51, %v2552_v20 }
 0xb2d   :  { %v3458_v53 = vpop.f32.mrf.mxu0  ;;  %v3468_v54 = vpop.f32.mrf.mxu1 }
 0xb2e   :  { %v2680_v38 = vand.u32 2147483647, %v2676_v39  ;;  %v2675_v55 = vadd.f32 %v2908_v49, %v2650_v52  ;;  %v2665_v56 = vadd.f32 %v3468_v54, %v3458_v53  ;;  %vm2708_vm4 = vcmp.ge.f32.partialorder %v2676_v39, 0.0 }
 0xb2f   :  { %v2562_v37 = vpop.f32.mrf.mxu0  ;;  %v2659_v57 = vpop.f32.mrf.mxu1 }
 0xb30   :  { %v2684_v58 = vsub.f32 0.0, %v2680_v38  ;;  %v2679_v59 = vand.u32 2147483647, %v2675_v55  ;;  %v2678_v60 = vadd.f32 %v2908_v49, %v2665_v56  ;;  %v2660_v61 = vadd.f32 %v2659_v57, %v2562_v37 }
 0xb31   :  { %vm2707_vm5 = vcmp.ge.f32.partialorder %v2675_v55, 0.0 }
 0xb32   :  { %v2689_v62 = vmul.f32 1.442695, %v2684_v58  ;;  %v2683_v63 = vsub.f32 0.0, %v2679_v59  ;;  %v2682_v0 = vand.u32 2147483647, %v2678_v60  ;;  %v2677_v1 = vadd.f32 %v2908_v49, %v2660_v61 }
 0xb33   :  { %vm2710_vm6 = vcmp.ge.f32.partialorder %v2678_v60, 0.0 }
 0xb34   :  { %3474 = vpow2.f32 %v2689_v62  ;;  %v2687_v2 = vmul.f32 1.442695, %v2683_v63  ;;  %v2686_v3 = vsub.f32 0.0, %v2682_v0  ;;  %v2681_v4 = vand.u32 2147483647, %v2677_v1 }
 0xb35   :  { %vm2709_vm7 = vcmp.ge.f32.partialorder %v2677_v1, 0.0 }
 0xb36   :  { %3476 = vpow2.f32 %v2687_v2  ;;  %v2693_v5 = vmul.f32 1.442695, %v2686_v3  ;;  %v2685_v6 = vsub.f32 0.0, %v2681_v4 }
 0xb38   :  { %3478 = vpow2.f32 %v2693_v5  ;;  %v2691_v7 = vmul.f32 1.442695, %v2685_v6 }
 0xb3a   :  { %3480 = vpow2.f32 %v2691_v7 }
 0xb41   :  { %v3475_v8 = vpop.eup %3474 }
 0xb42   :  { %v2696_v9 = vadd.f32 1.0, %v3475_v8 }
 0xb43   :  { %v3477_v10 = vpop.eup %3476 }
 0xb44   :  { %3482 = vrcp.f32 %v2696_v9  ;;  %v2695_v11 = vadd.f32 1.0, %v3477_v10 }
 0xb45   :  { %v3479_v12 = vpop.eup %3478 }
 0xb46   :  { %3484 = vrcp.f32 %v2695_v11  ;;  %v2698_v13 = vadd.f32 1.0, %v3479_v12 }
 0xb47   :  { %v3481_v14 = vpop.eup %3480 }
 0xb48   :  { %3486 = vrcp.f32 %v2698_v13  ;;  %v2697_v15 = vadd.f32 1.0, %v3481_v14 }
 0xb4a   :  { %3488 = vrcp.f32 %v2697_v15 }
 0xb51   :  { %v3483_v16 = vpop.eup %3482 }
 0xb52   :  { %v2712_v17 = vmul.f32 %v3483_v16, %v3475_v8 }
 0xb53   :  { %v3485_v18 = vpop.eup %3484 }
 0xb54   :  { %v2716_v19 = vsel %vm2708_vm4, %v3483_v16, %v2712_v17  ;;  %v2711_v21 = vmul.f32 %v3485_v18, %v3477_v10 }
 0xb55   :  { %v3487_v22 = vpop.eup %3486  ;;  %2720 = vst.msk [vmem:[#allocation2 + $0x8] sm:$0xff] %vm274_vm1, %v2716_v19 }
 0xb56   :  { %v2715_v23 = vsel %vm2707_vm5, %v3485_v18, %v2711_v21  ;;  %v2714_v24 = vmul.f32 %v3487_v22, %v3479_v12 }
 0xb57   :  { %2719 = vst.msk [vmem:[#allocation2] sm:$0xff] %vm274_vm1, %v2715_v23  ;;  %v3489_v25 = vpop.eup %3488 }
 0xb58   :  { %v2718_v26 = vsel %vm2710_vm6, %v3487_v22, %v2714_v24  ;;  %v2713_v27 = vmul.f32 %v3489_v25, %v3481_v14 }
 0xb59   :  { %2722 = vst.msk [vmem:[#allocation2 + $0x18] sm:$0xff] %vm274_vm1, %v2718_v26 }
 0xb5a   :  { %v2717_v28 = vsel %vm2709_vm7, %v3489_v25, %v2713_v27 }
 0xb5b   :  { %2721 = vst.msk [vmem:[#allocation2 + $0x10] sm:$0xff] %vm274_vm1, %v2717_v28 }
 0xb5c   :  { %3501 = shalt.err (!%p3498_p4)
}
 0xb5d   :  { %s3515_s28 = smov 128   ;;  %s3516_s3 = smov 8  }
 0xb5e   :  { %2734 = dma.vmem_to_hbm [thread:$0]  %s2729_s16, 512, %s4435_s17, [#allocation3], %s3515_s28, %s3515_s28, %s3516_s3  }
 0xb5f   :  { %3510 = dma.done.wait [#allocation3], 512  }
 0xb60   :  { %3511 = vsyncadd [#allocation3], 4294966784 }
 0xb61   :  { %2738 = vsyncpa [#allocation3], 1 }

</bundles_post_ra>
